<compile_context>
chip_gen: v5e
topology: v5e:2x2
jax: 0.10.0
libtpu: 0.0.40
codegen_flags: <defaults>
</compile_context>

<pallas_src>
import functools

import jax
import jax.numpy as jnp
from jax.experimental import pallas as pl
from jax.experimental.pallas import tpu as pltpu

LANES = 128
EPS = 1e-5
NEG_SLOPE = 0.2


def _round_up(x, m):
    return (x + m - 1) // m * m


# ----------------------------- Pallas kernels -------------------------------
def _gemm_bias_kernel(w_ref, x_ref, b_ref, o_ref, *, use_act):
    """conv-as-GEMM M-tile (transposed layout) + bias (+ LeakyReLU).

    w: (Cp, K) bf16 resident, x: (K, tn) bf16 streamed, out: (Cp, tn)."""
    acc = jnp.dot(w_ref[...], x_ref[...], preferred_element_type=jnp.float32)
    acc = acc + b_ref[...]                      # (Cp, 1) broadcast along lanes
    if use_act:
        acc = jnp.where(acc > 0.0, acc, NEG_SLOPE * acc)
    o_ref[...] = acc.astype(o_ref.dtype)


def _gemm_stats_kernel(w_ref, x_ref, y_ref, s1_ref, s2_ref):
    """BN layer pass: conv-as-GEMM M-tile plus per-tile per-channel sum and
    sum-of-squares computed in one sweep over the f32 accumulator.
    Zero-padded M columns contribute nothing; wrapper divides by the true M."""
    acc = jnp.dot(w_ref[...], x_ref[...], preferred_element_type=jnp.float32)
    y_ref[...] = acc.astype(y_ref.dtype)
    s1_ref[0] = jnp.sum(acc, axis=1, keepdims=True)        # (Cp, 1)
    s2_ref[0] = jnp.sum(acc * acc, axis=1, keepdims=True)  # (Cp, 1)


# ------------------------------ glue (JAX) ----------------------------------
def _im2col_t(x_cnhw, k, stride, pad):
    """Transposed im2col: (C, N, H, W) -> (K, M) with K=(tap, cin), M=(n,oh,ow)."""
    C, N, H, W = x_cnhw.shape
    xp = jnp.pad(x_cnhw, ((0, 0), (0, 0), (pad, pad), (pad, pad)))
    OH = (H + 2 * pad - k) // stride + 1
    OW = (W + 2 * pad - k) // stride + 1
    taps = []
    for di in range(k):
        for dj in range(k):
            taps.append(xp[:, :, di:di + OH * stride:stride,
                           dj:dj + OW * stride:stride])          # (C, N, OH, OW)
    p = jnp.stack(taps, axis=0)                                   # (k*k, C, N, OH, OW)
    return p.reshape(k * k * C, N * OH * OW), (OH, OW)


def _tile_lanes(M, tn_target):
    """Pick the lane-tile tn (multiple of 128) aiming for >= 2 tiles so the
    BlockSpec pipeline overlaps DMA/compute and v7x's 2nd TC gets work."""
    m_pad = _round_up(M, LANES)
    if m_pad <= LANES:                       # cannot split below one lane tile
        return m_pad, m_pad, 1
    tn = min(tn_target, _round_up(m_pad // 2, LANES))
    m_pad = _round_up(m_pad, tn)
    return m_pad, tn, m_pad // tn


def _vmem_limit(*block_bytes):
    # Each pipelined block is double-buffered once; add headroom for Mosaic
    # internal scratch.  Cap below v7x's 64 MiB physical VMEM.
    need = 2 * sum(block_bytes) + (4 << 20)
    return int(min(max(need, 16 << 20), 48 << 20))


def conv_layer(x_cnhw, w_oihw, *, stride, pad, bias=None, gamma=None, beta=None,
               out_bn=False, out_act=False, pre_scale=None, pre_shift=None,
               tn_target=512, out_dtype=jnp.bfloat16):
    """One conv layer as a transposed im2col GEMM.

    If pre_scale/pre_shift are given, the PREVIOUS layer's BN + LeakyReLU are
    applied here (plain jnp, fused by XLA into the im2col pad/slice/stack).
    For out_bn=True the returned activation is the raw conv output in bf16;
    its BN + LeakyReLU are deferred to the consumer via the returned
    per-channel (scale, shift)."""
    cout, cin, k, _ = w_oihw.shape
    Cin, N, H, W = x_cnhw.shape
    assert Cin == cin

    xf = x_cnhw.astype(jnp.float32)
    if pre_scale is not None:
        t = xf * pre_scale.reshape(-1, 1, 1, 1) + pre_shift.reshape(-1, 1, 1, 1)
        xf = jnp.where(t > 0.0, t, NEG_SLOPE * t)

    patches, (OH, OW) = _im2col_t(xf.astype(jnp.bfloat16), k, stride, pad)
    K, M = patches.shape
    Cp = _round_up(cout, 16)          # sublane pad only (bf16 packing), not 128 lanes

    m_pad, tn, grid_m = _tile_lanes(M, tn_target)
    if m_pad != M:
        patches = jnp.pad(patches, ((0, 0), (0, m_pad - M)))

    # OIHW -> (Cout, K) with K ordered (di, dj, cin) to match _im2col_t.
    w2d = jnp.transpose(w_oihw, (0, 2, 3, 1)).reshape(cout, K)
    w2d = jnp.pad(w2d, ((0, Cp - cout), (0, 0))).astype(jnp.bfloat16)

    w_spec = pl.BlockSpec((Cp, K), lambda i: (0, 0))          # resident
    # NOTE: for deeper grids (bigger batches) pipeline_mode=pl.Buffered(3) on
    # x_spec is the knob to hide DMA jitter of the only streaming operand.
    x_spec = pl.BlockSpec((K, tn), lambda i: (0, i))
    out_spec = pl.BlockSpec((Cp, tn), lambda i: (0, i))
    out_bytes = jnp.dtype(out_dtype).itemsize

    if not out_bn:
        b = jnp.zeros((cout,), jnp.float32) if bias is None else bias.astype(jnp.float32)
        b = jnp.pad(b, (0, Cp - cout)).reshape(Cp, 1)
        out = pl.pallas_call(
            functools.partial(_gemm_bias_kernel, use_act=out_act),
            out_shape=jax.ShapeDtypeStruct((Cp, m_pad), out_dtype),
            grid=(grid_m,),
            in_specs=[w_spec, x_spec, pl.BlockSpec((Cp, 1), lambda i: (0, 0))],
            out_specs=out_spec,
            compiler_params=pltpu.CompilerParams(
                dimension_semantics=("parallel",),
                vmem_limit_bytes=_vmem_limit(Cp * K * 2, K * tn * 2, Cp * 4,
                                             Cp * tn * out_bytes)),
        )(w2d, patches, b)
        scale_shift = None
    else:
        # Single pass: GEMM + per-tile partial channel stats (M axis stays
        # "parallel"); the full-M fold-up below is a tiny O(grid_m * Cp) op.
        y, p1, p2 = pl.pallas_call(
            _gemm_stats_kernel,
            out_shape=(jax.ShapeDtypeStruct((Cp, m_pad), jnp.bfloat16),
                       jax.ShapeDtypeStruct((grid_m, Cp, 1), jnp.float32),
                       jax.ShapeDtypeStruct((grid_m, Cp, 1), jnp.float32)),
            grid=(grid_m,),
            in_specs=[w_spec, x_spec],
            out_specs=(out_spec,
                       pl.BlockSpec((1, Cp, 1), lambda i: (i, 0, 0)),
                       pl.BlockSpec((1, Cp, 1), lambda i: (i, 0, 0))),
            compiler_params=pltpu.CompilerParams(
                dimension_semantics=("parallel",),
                vmem_limit_bytes=_vmem_limit(Cp * K * 2, K * tn * 2,
                                             Cp * tn * 2, Cp * 4, Cp * 4)),
        )(w2d, patches)

        # Per-channel BN fold-up over the FULL M (training-mode batch stats).
        # TODO(synk): E[x^2]-E[x]^2 in f32 is cancellation-prone for very large
        # |mean|/std; switch to per-tile centered sums if activations grow.
        s1 = jnp.sum(p1, axis=0)[:, 0]
        s2 = jnp.sum(p2, axis=0)[:, 0]
        mean = s1 / M
        var = jnp.maximum(s2 / M - mean * mean, 0.0)
        g = jnp.pad(gamma.astype(jnp.float32), (0, Cp - cout))
        be = jnp.pad(beta.astype(jnp.float32), (0, Cp - cout))
        scale = g * jax.lax.rsqrt(var + EPS)
        shift = be - mean * scale
        out = y
        scale_shift = (scale[:cout], shift[:cout])

    out = out[:cout, :M].reshape(cout, N, OH, OW)
    return out, scale_shift


def critic_forward(x_nchw, p):
    # NCHW -> (C, N, H, W): channels on sublanes, flattened (N,H,W) on lanes.
    x = jnp.transpose(x_nchw, (1, 0, 2, 3))
    # conv(k=4,s=2,p=1) + bias + LeakyReLU
    x, _ = conv_layer(x, p["w1"], bias=p["b1"], stride=2, pad=1, out_act=True)
    # 3 x [conv(no bias) + BN + LeakyReLU]; each BN + LeakyReLU is folded into
    # the consumer (next layer's im2col, or the final dot).
    x, ss = conv_layer(x, p["w2"], gamma=p["g2"], beta=p["be2"],
                       stride=2, pad=1, out_bn=True)
    x, ss = conv_layer(x, p["w3"], gamma=p["g3"], beta=p["be3"],
                       stride=2, pad=1, out_bn=True,
                       pre_scale=ss[0], pre_shift=ss[1])
    x, ss = conv_layer(x, p["w4"], gamma=p["g4"], beta=p["be4"],
                       stride=2, pad=1, out_bn=True,
                       pre_scale=ss[0], pre_shift=ss[1])
    # layer-4 BN + LeakyReLU + final conv(k=4,s=2,p=0,cout=1): a (1,K)x(K,N)
    # dot — plain XLA GEMM (cheaper than a Pallas launch + 1-lane store).
    t = x.astype(jnp.float32) * ss[0].reshape(-1, 1, 1, 1) + ss[1].reshape(-1, 1, 1, 1)
    t = jnp.where(t > 0.0, t, NEG_SLOPE * t)
    patches, (OH, OW) = _im2col_t(t, 4, 2, 0)                    # f32, tiny
    w5 = jnp.transpose(p["w5"], (0, 2, 3, 1)).reshape(1, -1)     # (1, K)
    N = x.shape[1]
    out = (w5 @ patches).reshape(1, N, OH, OW) + p["b5"].reshape(1, 1, 1, 1)
    return jnp.transpose(out, (1, 0, 2, 3))                      # (N, 1, OH, OW)


# -------------------------- deterministic params ----------------------------
def init_params(key, channels_img, features_d):
    fd = features_d
    keys = jax.random.split(key, 16)
    nrm = lambda k, s: (0.05 * jax.random.normal(k, s)).astype(jnp.float32)
    return {
        "w1": nrm(keys[0], (fd, channels_img, 4, 4)),
        "b1": nrm(keys[1], (fd,)),
        "w2": nrm(keys[2], (2 * fd, fd, 4, 4)),
        "g2": (1.0 + nrm(keys[3], (2 * fd,))),
        "be2": nrm(keys[4], (2 * fd,)),
        "w3": nrm(keys[5], (4 * fd, 2 * fd, 4, 4)),
        "g3": (1.0 + nrm(keys[6], (4 * fd,))),
        "be3": nrm(keys[7], (4 * fd,)),
        "w4": nrm(keys[8], (8 * fd, 4 * fd, 4, 4)),
        "g4": (1.0 + nrm(keys[9], (8 * fd,))),
        "be4": nrm(keys[10], (8 * fd,)),
        "w5": nrm(keys[11], (1, 8 * fd, 4, 4)),
        "b5": nrm(keys[12], (1,)),
    }


# --------------------------- pure-JAX reference -----------------------------
def reference_forward(x_nchw, p):
    def conv(x, w, stride, pad, b=None):
        y = jax.lax.conv_general_dilated(
            x, w, (stride, stride), [(pad, pad), (pad, pad)],
            dimension_numbers=("NCHW", "OIHW", "NCHW"))
        if b is not None:
            y = y + b.reshape(1, -1, 1, 1)
        return y

    def bn(x, g, b):
        mean = jnp.mean(x, axis=(0, 2, 3), keepdims=True)
        var = jnp.mean(jnp.square(x - mean), axis=(0, 2, 3), keepdims=True)
        return ((x - mean) * jax.lax.rsqrt(var + EPS)
                * g.reshape(1, -1, 1, 1) + b.reshape(1, -1, 1, 1))

    lrelu = lambda x: jnp.where(x > 0, x, NEG_SLOPE * x)
    x = lrelu(conv(x_nchw, p["w1"], 2, 1, p["b1"]))
    x = lrelu(bn(conv(x, p["w2"], 2, 1), p["g2"], p["be2"]))
    x = lrelu(bn(conv(x, p["w3"], 2, 1), p["g3"], p["be3"]))
    x = lrelu(bn(conv(x, p["w4"], 2, 1), p["g4"], p["be4"]))
    return conv(x, p["w5"], 2, 0, p["b5"])


# ---------------------------------- main -------------------------------------
if __name__ == "__main__":
    key = jax.random.PRNGKey(0)
    k_x, k_p = jax.random.split(key)

    # 64x64 input needed: 5 stride-2 k=4 convs -> 1x1 output.
    batch, channels_img, features_d, img = 2, 3, 8, 64
    x = jax.random.normal(k_x, (batch, channels_img, img, img), jnp.float32)
    params = init_params(k_p, channels_img, features_d)

    out = jax.jit(critic_forward)(x, params)
    out = jax.block_until_ready(out)
    assert out.shape == (batch, 1, 1, 1), out.shape

    ref = reference_forward(x, params)
    # bf16 MXU operands / bf16 inter-layer activations => compare against the
    # f32 reference at a bf16-appropriate tolerance.
    if not jnp.allclose(out, ref, rtol=5e-2, atol=5e-2):
        raise RuntimeError(
            f"mismatch: pallas={out.ravel()} ref={ref.ravel()} "
            f"maxdiff={jnp.max(jnp.abs(out - ref))}")

    print("KERNEL_OK")
</pallas_src>

<mosaic_0001>
module attributes {stable_mosaic.version = 11 : i64} {
  func.func @_gemm_bias_kernel(%arg0: i32, %arg1: memref<16x48xbf16, #tpu.memory_space<vmem>>, %arg2: memref<48x512xbf16, #tpu.memory_space<vmem>>, %arg3: memref<16x1xf32, #tpu.memory_space<vmem>>, %arg4: memref<16x512xbf16, #tpu.memory_space<vmem>>) attributes {dimension_semantics = [#tpu.dimension_semantics<parallel>], iteration_bounds = array<i64: 4>, scalar_prefetch = 0 : i64, scratch_operands = 0 : i64, tpu.core_type = #tpu.core_type<tc>, window_params = [{pipeline_mode = #tpu.pipeline_mode<synchronous>, transform_indices = @transform_0, window_bounds = array<i64: 16, 48>}, {transform_indices = @transform_1, window_bounds = array<i64: 48, 512>}, {pipeline_mode = #tpu.pipeline_mode<synchronous>, transform_indices = @transform_2, window_bounds = array<i64: 16, 1>}, {transform_indices = @transform_3, window_bounds = array<i64: 16, 512>}]} {
    %c0 = arith.constant 0 : index
    %c0_0 = arith.constant 0 : index
    %0 = vector.load %arg1[%c0, %c0_0] : memref<16x48xbf16, #tpu.memory_space<vmem>>, vector<16x48xbf16>
    %c0_1 = arith.constant 0 : index
    %c0_2 = arith.constant 0 : index
    %1 = vector.load %arg2[%c0_1, %c0_2] : memref<48x512xbf16, #tpu.memory_space<vmem>>, vector<48x512xbf16>
    %cst = arith.constant dense<0.000000e+00> : vector<16x512xf32>
    %2 = tpu.matmul %0, %1, %cst {dimension_numbers = #tpu.dot_dimension_numbers<[1], [0], [0], [1], [0, 0, 1, 1], [], []>} : vector<16x48xbf16>, vector<48x512xbf16>, vector<16x512xf32> -> vector<16x512xf32>
    %c0_3 = arith.constant 0 : index
    %c0_4 = arith.constant 0 : index
    %3 = vector.load %arg3[%c0_3, %c0_4] : memref<16x1xf32, #tpu.memory_space<vmem>>, vector<16x1xf32>
    %4 = vector.broadcast %3 : vector<16x1xf32> to vector<16x512xf32>
    %5 = arith.addf %2, %4 : vector<16x512xf32>
    %cst_5 = arith.constant 0.000000e+00 : f32
    %6 = vector.broadcast %cst_5 : f32 to vector<16x512xf32>
    %7 = arith.cmpf ogt, %5, %6 : vector<16x512xf32>
    %cst_6 = arith.constant 2.000000e-01 : f32
    %8 = vector.broadcast %cst_6 : f32 to vector<16x512xf32>
    %9 = arith.mulf %8, %5 : vector<16x512xf32>
    %10 = arith.select %7, %5, %9 : vector<16x512xi1>, vector<16x512xf32>
    %11 = arith.truncf %10 : vector<16x512xf32> to vector<16x512xbf16>
    %c0_7 = arith.constant 0 : index
    %c0_8 = arith.constant 0 : index
    %12 = vector.load %arg4[%c0_7, %c0_8] : memref<16x512xbf16, #tpu.memory_space<vmem>>, vector<16x512xbf16>
    tpu.vector_store %arg4[%c0_7, %c0_8], %11 {strides = array<i32>} : memref<16x512xbf16, #tpu.memory_space<vmem>>, vector<16x512xbf16>,
    return
  }
  func.func @transform_0(%arg0: i32) -> (i32, i32) {
    %c0_i32 = arith.constant 0 : i32
    %c0_i32_0 = arith.constant 0 : i32
    %c0_i32_1 = arith.constant 0 : i32
    return %c0_i32, %c0_i32_0 : i32, i32
  }
  func.func @transform_1(%arg0: i32) -> (i32, i32) {
    %c0_i32 = arith.constant 0 : i32
    %c0_i32_0 = arith.constant 0 : i32
    return %c0_i32, %arg0 : i32, i32
  }
  func.func @transform_2(%arg0: i32) -> (i32, i32) {
    %c0_i32 = arith.constant 0 : i32
    %c0_i32_0 = arith.constant 0 : i32
    %c0_i32_1 = arith.constant 0 : i32
    return %c0_i32, %c0_i32_0 : i32, i32
  }
  func.func @transform_3(%arg0: i32) -> (i32, i32) {
    %c0_i32 = arith.constant 0 : i32
    %c0_i32_0 = arith.constant 0 : i32
    return %c0_i32, %arg0 : i32, i32
  }
}

module attributes {stable_mosaic.version = 11 : i64} {
  func.func @_gemm_stats_kernel(%arg0: i32, %arg1: memref<16x128xbf16, #tpu.memory_space<vmem>>, %arg2: memref<128x256xbf16, #tpu.memory_space<vmem>>, %arg3: memref<16x256xbf16, #tpu.memory_space<vmem>>, %arg4: memref<1x16x1xf32, #tpu.memory_space<vmem>>, %arg5: memref<1x16x1xf32, #tpu.memory_space<vmem>>) attributes {dimension_semantics = [#tpu.dimension_semantics<parallel>], iteration_bounds = array<i64: 2>, scalar_prefetch = 0 : i64, scratch_operands = 0 : i64, tpu.core_type = #tpu.core_type<tc>, window_params = [{pipeline_mode = #tpu.pipeline_mode<synchronous>, transform_indices = @transform_0, window_bounds = array<i64: 16, 128>}, {transform_indices = @transform_1, window_bounds = array<i64: 128, 256>}, {transform_indices = @transform_2, window_bounds = array<i64: 16, 256>}, {transform_indices = @transform_3, window_bounds = array<i64: 1, 16, 1>}, {transform_indices = @transform_4, window_bounds = array<i64: 1, 16, 1>}]} {
    %c0 = arith.constant 0 : index
    %c0_0 = arith.constant 0 : index
    %0 = vector.load %arg1[%c0, %c0_0] : memref<16x128xbf16, #tpu.memory_space<vmem>>, vector<16x128xbf16>
    %c0_1 = arith.constant 0 : index
    %c0_2 = arith.constant 0 : index
    %1 = vector.load %arg2[%c0_1, %c0_2] : memref<128x256xbf16, #tpu.memory_space<vmem>>, vector<128x256xbf16>
    %cst = arith.constant dense<0.000000e+00> : vector<16x256xf32>
    %2 = tpu.matmul %0, %1, %cst {dimension_numbers = #tpu.dot_dimension_numbers<[1], [0], [0], [1], [0, 0, 1, 1], [], []>} : vector<16x128xbf16>, vector<128x256xbf16>, vector<16x256xf32> -> vector<16x256xf32>
    %3 = arith.truncf %2 : vector<16x256xf32> to vector<16x256xbf16>
    %c0_3 = arith.constant 0 : index
    %c0_4 = arith.constant 0 : index
    %4 = vector.load %arg3[%c0_3, %c0_4] : memref<16x256xbf16, #tpu.memory_space<vmem>>, vector<16x256xbf16>
    tpu.vector_store %arg3[%c0_3, %c0_4], %3 {strides = array<i32>} : memref<16x256xbf16, #tpu.memory_space<vmem>>, vector<16x256xbf16>,
    %cst_5 = arith.constant dense<0.000000e+00> : vector<16xf32>
    %5 = vector.multi_reduction <add>, %2, %cst_5 [1] : vector<16x256xf32> to vector<16xf32>
    %6 = vector.shape_cast %5 : vector<16xf32> to vector<16x1xf32>
    %c0_6 = arith.constant 0 : index
    %c0_7 = arith.constant 0 : index
    %c0_8 = arith.constant 0 : index
    %7 = vector.load %arg4[%c0_6, %c0_7, %c0_8] : memref<1x16x1xf32, #tpu.memory_space<vmem>>, vector<1x16x1xf32>
    %8 = vector.shape_cast %7 : vector<1x16x1xf32> to vector<16x1xf32>
    %9 = vector.shape_cast %6 : vector<16x1xf32> to vector<1x16x1xf32>
    tpu.vector_store %arg4[%c0_6, %c0_7, %c0_8], %9 {strides = array<i32>} : memref<1x16x1xf32, #tpu.memory_space<vmem>>, vector<1x16x1xf32>,
    %10 = arith.mulf %2, %2 : vector<16x256xf32>
    %cst_9 = arith.constant dense<0.000000e+00> : vector<16xf32>
    %11 = vector.multi_reduction <add>, %10, %cst_9 [1] : vector<16x256xf32> to vector<16xf32>
    %12 = vector.shape_cast %11 : vector<16xf32> to vector<16x1xf32>
    %c0_10 = arith.constant 0 : index
    %c0_11 = arith.constant 0 : index
    %c0_12 = arith.constant 0 : index
    %13 = vector.load %arg5[%c0_10, %c0_11, %c0_12] : memref<1x16x1xf32, #tpu.memory_space<vmem>>, vector<1x16x1xf32>
    %14 = vector.shape_cast %13 : vector<1x16x1xf32> to vector<16x1xf32>
    %15 = vector.shape_cast %12 : vector<16x1xf32> to vector<1x16x1xf32>
    tpu.vector_store %arg5[%c0_10, %c0_11, %c0_12], %15 {strides = array<i32>} : memref<1x16x1xf32, #tpu.memory_space<vmem>>, vector<1x16x1xf32>,
    return
  }
  func.func @transform_0(%arg0: i32) -> (i32, i32) {
    %c0_i32 = arith.constant 0 : i32
    %c0_i32_0 = arith.constant 0 : i32
    %c0_i32_1 = arith.constant 0 : i32
    return %c0_i32, %c0_i32_0 : i32, i32
  }
  func.func @transform_1(%arg0: i32) -> (i32, i32) {
    %c0_i32 = arith.constant 0 : i32
    %c0_i32_0 = arith.constant 0 : i32
    return %c0_i32, %arg0 : i32, i32
  }
  func.func @transform_2(%arg0: i32) -> (i32, i32) {
    %c0_i32 = arith.constant 0 : i32
    %c0_i32_0 = arith.constant 0 : i32
    return %c0_i32, %arg0 : i32, i32
  }
  func.func @transform_3(%arg0: i32) -> (i32, i32, i32) {
    %c0_i32 = arith.constant 0 : i32
    %c0_i32_0 = arith.constant 0 : i32
    %c0_i32_1 = arith.constant 0 : i32
    return %arg0, %c0_i32, %c0_i32_0 : i32, i32, i32
  }
  func.func @transform_4(%arg0: i32) -> (i32, i32, i32) {
    %c0_i32 = arith.constant 0 : i32
    %c0_i32_0 = arith.constant 0 : i32
    %c0_i32_1 = arith.constant 0 : i32
    return %arg0, %c0_i32, %c0_i32_0 : i32, i32, i32
  }
}

module attributes {stable_mosaic.version = 11 : i64} {
  func.func @_gemm_stats_kernel(%arg0: i32, %arg1: memref<32x256xbf16, #tpu.memory_space<vmem>>, %arg2: memref<256x128xbf16, #tpu.memory_space<vmem>>, %arg3: memref<32x128xbf16, #tpu.memory_space<vmem>>, %arg4: memref<1x32x1xf32, #tpu.memory_space<vmem>>, %arg5: memref<1x32x1xf32, #tpu.memory_space<vmem>>) attributes {dimension_semantics = [#tpu.dimension_semantics<parallel>], iteration_bounds = array<i64: 1>, scalar_prefetch = 0 : i64, scratch_operands = 0 : i64, tpu.core_type = #tpu.core_type<tc>, window_params = [{pipeline_mode = #tpu.pipeline_mode<synchronous>, transform_indices = @transform_0, window_bounds = array<i64: 32, 256>}, {transform_indices = @transform_1, window_bounds = array<i64: 256, 128>}, {transform_indices = @transform_2, window_bounds = array<i64: 32, 128>}, {transform_indices = @transform_3, window_bounds = array<i64: 1, 32, 1>}, {transform_indices = @transform_4, window_bounds = array<i64: 1, 32, 1>}]} {
    %c0 = arith.constant 0 : index
    %c0_0 = arith.constant 0 : index
    %0 = vector.load %arg1[%c0, %c0_0] : memref<32x256xbf16, #tpu.memory_space<vmem>>, vector<32x256xbf16>
    %c0_1 = arith.constant 0 : index
    %c0_2 = arith.constant 0 : index
    %1 = vector.load %arg2[%c0_1, %c0_2] : memref<256x128xbf16, #tpu.memory_space<vmem>>, vector<256x128xbf16>
    %cst = arith.constant dense<0.000000e+00> : vector<32x128xf32>
    %2 = tpu.matmul %0, %1, %cst {dimension_numbers = #tpu.dot_dimension_numbers<[1], [0], [0], [1], [0, 0, 1, 1], [], []>} : vector<32x256xbf16>, vector<256x128xbf16>, vector<32x128xf32> -> vector<32x128xf32>
    %3 = arith.truncf %2 : vector<32x128xf32> to vector<32x128xbf16>
    %c0_3 = arith.constant 0 : index
    %c0_4 = arith.constant 0 : index
    %4 = vector.load %arg3[%c0_3, %c0_4] : memref<32x128xbf16, #tpu.memory_space<vmem>>, vector<32x128xbf16>
    tpu.vector_store %arg3[%c0_3, %c0_4], %3 {strides = array<i32>} : memref<32x128xbf16, #tpu.memory_space<vmem>>, vector<32x128xbf16>,
    %cst_5 = arith.constant dense<0.000000e+00> : vector<32xf32>
    %5 = vector.multi_reduction <add>, %2, %cst_5 [1] : vector<32x128xf32> to vector<32xf32>
    %6 = vector.shape_cast %5 : vector<32xf32> to vector<32x1xf32>
    %c0_6 = arith.constant 0 : index
    %c0_7 = arith.constant 0 : index
    %c0_8 = arith.constant 0 : index
    %7 = vector.load %arg4[%c0_6, %c0_7, %c0_8] : memref<1x32x1xf32, #tpu.memory_space<vmem>>, vector<1x32x1xf32>
    %8 = vector.shape_cast %7 : vector<1x32x1xf32> to vector<32x1xf32>
    %9 = vector.shape_cast %6 : vector<32x1xf32> to vector<1x32x1xf32>
    tpu.vector_store %arg4[%c0_6, %c0_7, %c0_8], %9 {strides = array<i32>} : memref<1x32x1xf32, #tpu.memory_space<vmem>>, vector<1x32x1xf32>,
    %10 = arith.mulf %2, %2 : vector<32x128xf32>
    %cst_9 = arith.constant dense<0.000000e+00> : vector<32xf32>
    %11 = vector.multi_reduction <add>, %10, %cst_9 [1] : vector<32x128xf32> to vector<32xf32>
    %12 = vector.shape_cast %11 : vector<32xf32> to vector<32x1xf32>
    %c0_10 = arith.constant 0 : index
    %c0_11 = arith.constant 0 : index
    %c0_12 = arith.constant 0 : index
    %13 = vector.load %arg5[%c0_10, %c0_11, %c0_12] : memref<1x32x1xf32, #tpu.memory_space<vmem>>, vector<1x32x1xf32>
    %14 = vector.shape_cast %13 : vector<1x32x1xf32> to vector<32x1xf32>
    %15 = vector.shape_cast %12 : vector<32x1xf32> to vector<1x32x1xf32>
    tpu.vector_store %arg5[%c0_10, %c0_11, %c0_12], %15 {strides = array<i32>} : memref<1x32x1xf32, #tpu.memory_space<vmem>>, vector<1x32x1xf32>,
    return
  }
  func.func @transform_0(%arg0: i32) -> (i32, i32) {
    %c0_i32 = arith.constant 0 : i32
    %c0_i32_0 = arith.constant 0 : i32
    %c0_i32_1 = arith.constant 0 : i32
    return %c0_i32, %c0_i32_0 : i32, i32
  }
  func.func @transform_1(%arg0: i32) -> (i32, i32) {
    %c0_i32 = arith.constant 0 : i32
    %c0_i32_0 = arith.constant 0 : i32
    return %c0_i32, %arg0 : i32, i32
  }
  func.func @transform_2(%arg0: i32) -> (i32, i32) {
    %c0_i32 = arith.constant 0 : i32
    %c0_i32_0 = arith.constant 0 : i32
    return %c0_i32, %arg0 : i32, i32
  }
  func.func @transform_3(%arg0: i32) -> (i32, i32, i32) {
    %c0_i32 = arith.constant 0 : i32
    %c0_i32_0 = arith.constant 0 : i32
    %c0_i32_1 = arith.constant 0 : i32
    return %arg0, %c0_i32, %c0_i32_0 : i32, i32, i32
  }
  func.func @transform_4(%arg0: i32) -> (i32, i32, i32) {
    %c0_i32 = arith.constant 0 : i32
    %c0_i32_0 = arith.constant 0 : i32
    %c0_i32_1 = arith.constant 0 : i32
    return %arg0, %c0_i32, %c0_i32_0 : i32, i32, i32
  }
}

module attributes {stable_mosaic.version = 11 : i64} {
  func.func @_gemm_stats_kernel(%arg0: i32, %arg1: memref<64x512xbf16, #tpu.memory_space<vmem>>, %arg2: memref<512x128xbf16, #tpu.memory_space<vmem>>, %arg3: memref<64x128xbf16, #tpu.memory_space<vmem>>, %arg4: memref<1x64x1xf32, #tpu.memory_space<vmem>>, %arg5: memref<1x64x1xf32, #tpu.memory_space<vmem>>) attributes {dimension_semantics = [#tpu.dimension_semantics<parallel>], iteration_bounds = array<i64: 1>, scalar_prefetch = 0 : i64, scratch_operands = 0 : i64, tpu.core_type = #tpu.core_type<tc>, window_params = [{pipeline_mode = #tpu.pipeline_mode<synchronous>, transform_indices = @transform_0, window_bounds = array<i64: 64, 512>}, {transform_indices = @transform_1, window_bounds = array<i64: 512, 128>}, {transform_indices = @transform_2, window_bounds = array<i64: 64, 128>}, {transform_indices = @transform_3, window_bounds = array<i64: 1, 64, 1>}, {transform_indices = @transform_4, window_bounds = array<i64: 1, 64, 1>}]} {
    %c0 = arith.constant 0 : index
    %c0_0 = arith.constant 0 : index
    %0 = vector.load %arg1[%c0, %c0_0] : memref<64x512xbf16, #tpu.memory_space<vmem>>, vector<64x512xbf16>
    %c0_1 = arith.constant 0 : index
    %c0_2 = arith.constant 0 : index
    %1 = vector.load %arg2[%c0_1, %c0_2] : memref<512x128xbf16, #tpu.memory_space<vmem>>, vector<512x128xbf16>
    %cst = arith.constant dense<0.000000e+00> : vector<64x128xf32>
    %2 = tpu.matmul %0, %1, %cst {dimension_numbers = #tpu.dot_dimension_numbers<[1], [0], [0], [1], [0, 0, 1, 1], [], []>} : vector<64x512xbf16>, vector<512x128xbf16>, vector<64x128xf32> -> vector<64x128xf32>
    %3 = arith.truncf %2 : vector<64x128xf32> to vector<64x128xbf16>
    %c0_3 = arith.constant 0 : index
    %c0_4 = arith.constant 0 : index
    %4 = vector.load %arg3[%c0_3, %c0_4] : memref<64x128xbf16, #tpu.memory_space<vmem>>, vector<64x128xbf16>
    tpu.vector_store %arg3[%c0_3, %c0_4], %3 {strides = array<i32>} : memref<64x128xbf16, #tpu.memory_space<vmem>>, vector<64x128xbf16>,
    %cst_5 = arith.constant dense<0.000000e+00> : vector<64xf32>
    %5 = vector.multi_reduction <add>, %2, %cst_5 [1] : vector<64x128xf32> to vector<64xf32>
    %6 = vector.shape_cast %5 : vector<64xf32> to vector<64x1xf32>
    %c0_6 = arith.constant 0 : index
    %c0_7 = arith.constant 0 : index
    %c0_8 = arith.constant 0 : index
    %7 = vector.load %arg4[%c0_6, %c0_7, %c0_8] : memref<1x64x1xf32, #tpu.memory_space<vmem>>, vector<1x64x1xf32>
    %8 = vector.shape_cast %7 : vector<1x64x1xf32> to vector<64x1xf32>
    %9 = vector.shape_cast %6 : vector<64x1xf32> to vector<1x64x1xf32>
    tpu.vector_store %arg4[%c0_6, %c0_7, %c0_8], %9 {strides = array<i32>} : memref<1x64x1xf32, #tpu.memory_space<vmem>>, vector<1x64x1xf32>,
    %10 = arith.mulf %2, %2 : vector<64x128xf32>
    %cst_9 = arith.constant dense<0.000000e+00> : vector<64xf32>
    %11 = vector.multi_reduction <add>, %10, %cst_9 [1] : vector<64x128xf32> to vector<64xf32>
    %12 = vector.shape_cast %11 : vector<64xf32> to vector<64x1xf32>
    %c0_10 = arith.constant 0 : index
    %c0_11 = arith.constant 0 : index
    %c0_12 = arith.constant 0 : index
    %13 = vector.load %arg5[%c0_10, %c0_11, %c0_12] : memref<1x64x1xf32, #tpu.memory_space<vmem>>, vector<1x64x1xf32>
    %14 = vector.shape_cast %13 : vector<1x64x1xf32> to vector<64x1xf32>
    %15 = vector.shape_cast %12 : vector<64x1xf32> to vector<1x64x1xf32>
    tpu.vector_store %arg5[%c0_10, %c0_11, %c0_12], %15 {strides = array<i32>} : memref<1x64x1xf32, #tpu.memory_space<vmem>>, vector<1x64x1xf32>,
    return
  }
  func.func @transform_0(%arg0: i32) -> (i32, i32) {
    %c0_i32 = arith.constant 0 : i32
    %c0_i32_0 = arith.constant 0 : i32
    %c0_i32_1 = arith.constant 0 : i32
    return %c0_i32, %c0_i32_0 : i32, i32
  }
  func.func @transform_1(%arg0: i32) -> (i32, i32) {
    %c0_i32 = arith.constant 0 : i32
    %c0_i32_0 = arith.constant 0 : i32
    return %c0_i32, %arg0 : i32, i32
  }
  func.func @transform_2(%arg0: i32) -> (i32, i32) {
    %c0_i32 = arith.constant 0 : i32
    %c0_i32_0 = arith.constant 0 : i32
    return %c0_i32, %arg0 : i32, i32
  }
  func.func @transform_3(%arg0: i32) -> (i32, i32, i32) {
    %c0_i32 = arith.constant 0 : i32
    %c0_i32_0 = arith.constant 0 : i32
    %c0_i32_1 = arith.constant 0 : i32
    return %arg0, %c0_i32, %c0_i32_0 : i32, i32, i32
  }
  func.func @transform_4(%arg0: i32) -> (i32, i32, i32) {
    %c0_i32 = arith.constant 0 : i32
    %c0_i32_0 = arith.constant 0 : i32
    %c0_i32_1 = arith.constant 0 : i32
    return %arg0, %c0_i32, %c0_i32_0 : i32, i32, i32
  }
}

</mosaic_0001>

<bundles_post_ra>
// kernel: critic_forward.4
= control target key start
LH: loop header
LB: loop body
LE: loop exit
PB: predicated region body
PF: predicated region fallthrough
CT: control target
= control target key end

     0   :  { %s639_s12 = smov 0   ;;  %s641_s13 = smov 0   ;;  %s748_s0 = inlined_call_operand.vmem [shape: bf16[16,48], index: 0, kind: input, shape index: {}]   ;;  %s749_s1 = inlined_call_operand.vmem [shape: bf16[48,2048], index: 1, kind: input, shape index: {}]   ;;  %s750_s2 = inlined_call_operand.vmem [shape: f32[16,1], index: 2, kind: input, shape index: {}]   ;;  %s751_s3 = inlined_call_operand.vmem [shape: bf16[16,2048], index: 3, kind: output, shape index: {}]  }
   0x1   :  { %s643_s14 = smov 0  }
   0x2 LB: > { %s482_s15 = sadd.s32 4294967295, %s616_s14   ;;  %s656_s16 = sadd.s32 1, %s616_s14   ;;  %s616_s14 = sphi %s643_s14, %s755_s14   ;;  %s612_s13 = sphi %s641_s13, %s754_s13   ;;  %s608_s12 = sphi %s639_s12, %s753_s12  }
   0x3   : > { %s38_s17 = ssub.s32 %s616_s14, %s656_s16  ;;  %s41_s18 = sadd.s32 1, %s612_s13 }
   0x4   : > { %p39_p0 = scmp.eq.s32.totalorder %s38_s17, 0  ;;  %p48_p1 = scmp.ne.s32.totalorder %s612_s13, %s608_s12 }
   0x5   : > { %p49_p2 = scmp.eq.s32.totalorder %s616_s14, 0  ;;  %p99_p3 = scmp.eq.s32.totalorder %s482_s15, 3 }
   0x6   : > { %s667_s19 = scalar_select %p39_p0, %s612_s13, %s41_s18  }
   0x7   : > { %p50_p4 = por %p49_p2, %p48_p1  ;;  %p669_p5 = por %p99_p3, %p48_p1 }
   0x8   : > { %p485_p6 = scmp.ge.s32.totalorder %s616_s14, 4 }
   0xa   : > { %127 = sbr.rel (%p485_p6) target bundleno = 31 (0x1f), region = 24 }
   0xf   : > { %130 = sbr.rel (!%p50_p4) target bundleno = 31 (0x1f), region = 28  ;;  %s132_s21 = sand.u32 (%p50_p4), 1, %s612_s13  }
  0x10   : > { %s551_s22 = sshll.u32 (%p50_p4), %s616_s14, 4  ;;  %s566_s23 = smul.u32 (%p50_p4), 96, %s132_s21 }
  0x11   : > { %s137_s26 = scalar_lea.vmem (%p50_p4), %s749_s1, %s551_s22 }
  0x12   : > { %v150_v0 = vld [vmem:[%s137_s26] sm:$0xff] (%p50_p4)  ;;  %v152_v1 = vld [vmem:[%s137_s26 + $0x8] sm:$0xff] (%p50_p4)  ;;  %s134_s27 = scalar_lea.vmem (%p50_p4), [#allocation2], %s566_s23 }
  0x13   : > { %v154_v2 = vld [vmem:[%s137_s26 + $0x40] sm:$0xff] (%p50_p4)  ;;  %151 = vst [vmem:[%s134_s27] sm:$0xff] (%p50_p4), %v150_v0  ;;  %v156_v3 = vld [vmem:[%s137_s26 + $0x48] sm:$0xff] (%p50_p4) }
  0x14   : > { %153 = vst [vmem:[%s134_s27 + $0x8] sm:$0xff] %v152_v1  ;;  %v158_v4 = vld [vmem:[%s137_s26 + $0x80] sm:$0xff]  ;;  %v160_v5 = vld [vmem:[%s137_s26 + $0x88] sm:$0xff] }
  0x15   : > { %155 = vst [vmem:[%s134_s27 + $0x10] sm:$0xff] %v154_v2  ;;  %v162_v6 = vld [vmem:[%s137_s26 + $0xc0] sm:$0xff]  ;;  %v164_v7 = vld [vmem:[%s137_s26 + $0xc8] sm:$0xff] }
  0x16   : > { %157 = vst [vmem:[%s134_s27 + $0x18] sm:$0xff] %v156_v3  ;;  %v166_v8 = vld [vmem:[%s137_s26 + $0x100] sm:$0xff]  ;;  %v168_v9 = vld [vmem:[%s137_s26 + $0x108] sm:$0xff] }
  0x17   : > { %159 = vst [vmem:[%s134_s27 + $0x20] sm:$0xff] %v158_v4  ;;  %v170_v10 = vld [vmem:[%s137_s26 + $0x140] sm:$0xff]  ;;  %v172_v11 = vld [vmem:[%s137_s26 + $0x148] sm:$0xff] }
  0x18   : > { %161 = vst [vmem:[%s134_s27 + $0x28] sm:$0xff] %v160_v5 }
  0x19   : > { %163 = vst [vmem:[%s134_s27 + $0x30] sm:$0xff] %v162_v6 }
  0x1a   : > { %165 = vst [vmem:[%s134_s27 + $0x38] sm:$0xff] %v164_v7 }
  0x1b   : > { %167 = vst [vmem:[%s134_s27 + $0x40] sm:$0xff] %v166_v8 }
  0x1c   : > { %169 = vst [vmem:[%s134_s27 + $0x48] sm:$0xff] %v168_v9 }
  0x1d   : > { %171 = vst [vmem:[%s134_s27 + $0x50] sm:$0xff] %v170_v10 }
  0x1e   : > { %173 = vst [vmem:[%s134_s27 + $0x58] sm:$0xff] %v172_v11 }
  0x1f PF: > { %p488_p7 = scmp.ge.s32.totalorder %s616_s14, 1  ;;  %p178_p8 = scmp.lt.s32.totalorder %s616_s14, 5 }
  0x21   : > { %p179_p9 = pnand %p488_p7, %p178_p8 }
  0x22   : > { %s185_s28 = sand.u32 (!%p179_p9), 1, %s608_s12  }
  0x23   : > { %182 = sbr.rel (%p179_p9) target bundleno = 213 (0xd5), region = 51  ;;  %s489_s10 = sshll.u32 (!%p179_p9), %s185_s28, 5 }
  0x24   : > { %s567_s4 = smul.u32 (!%p179_p9), 96, %s185_s28  ;;  %s721_s11 = scalar_lea.vmem (!%p179_p9), [#allocation3], %s489_s10 }
  0x26   : > { %s687_s5 = scalar_lea.vmem (!%p179_p9), [#allocation2], %s567_s4 }
  0x28   : > { %v224_v12 = vld [vmem:[%s750_s2] sm:$0xff]  ;;  %v618_v13 = vmov 0   ;;  %v563_v15 = vld [vmem:[%s687_s5 + $0x4c] sm:$0xf0]  ;;  %v530_v18 = vld [vmem:[%s687_s5 + $0x50] sm:$0xf0] }
  0x29   : > { %593 = vset.pattern.permute.xlu0 %v618_v13  ;;  %v528_v14 = vld [vmem:[%s687_s5 + $0x40] sm:$0xf]  ;;  %v561_v16 = vld [vmem:[%s687_s5 + $0x44] sm:$0xf]  ;;  %v536_v19 = vld [vmem:[%s687_s5 + $0x48] sm:$0xf] }
  0x2a   : > { %228 = vperm.xlu0 %593, %v224_v12   ;;  %v529_v17 = vor.u32 %v563_v15, %v528_v14  ;;  %v564_v20 = vld [vmem:[%s687_s5 + $0x54] sm:$0xf0]  ;;  %v225_v21 = vld [vmem:[%s750_s2 + $0x8] sm:$0xff]  ;;  %v533_v22 = vor.u32 %v561_v16, %v530_v18  ;;  %v538_v25 = vld [vmem:[%s687_s5 + $0x58] sm:$0xf0]  ;;  %vm301_vm0 = vcmask 392192  }
  0x2b   : > { %v537_v23 = vor.u32 %v564_v20, %v536_v19  ;;  %v562_v24 = vld [vmem:[%s687_s5 + $0x4c] sm:$0xf]  ;;  %v512_v26 = vld [vmem:[%s687_s5 + $0x20] sm:$0xf]  ;;  %v559_v28 = vld [vmem:[%s687_s5 + $0x2c] sm:$0xf0] }
  0x2c   : > { %310 = vmatpush.bf16.msra.mxu0 %v529_v17  ;;  %v541_v27 = vor.u32 %v562_v24, %v538_v25  ;;  %v557_v29 = vld [vmem:[%s687_s5 + $0x24] sm:$0xf]  ;;  %v514_v30 = vld [vmem:[%s687_s5 + $0x30] sm:$0xf0]  ;;  %324 = vmatpush.bf16.msra.mxu1 %v533_v22  ;;  %v513_v31 = vor.u32 %v559_v28, %v512_v26  ;;  %v520_v33 = vld [vmem:[%s687_s5 + $0x28] sm:$0xf] }
  0x2d   : > { %338 = vmatpush.bf16.msra.mxu2 %v537_v23  ;;  %v517_v32 = vor.u32 %v557_v29, %v514_v30  ;;  %v560_v34 = vld [vmem:[%s687_s5 + $0x34] sm:$0xf0]  ;;  %v558_v35 = vld [vmem:[%s687_s5 + $0x2c] sm:$0xf]  ;;  %v522_v37 = vld [vmem:[%s687_s5 + $0x38] sm:$0xf0] }
  0x2e   : > { %352 = vmatpush.bf16.msra.mxu3 %v541_v27  ;;  %v521_v36 = vor.u32 %v560_v34, %v520_v33  ;;  %v496_v38 = vld [vmem:[%s687_s5] sm:$0xf]  ;;  %v555_v39 = vld [vmem:[%s687_s5 + $0xc] sm:$0xf0]  ;;  %v525_v40 = vor.u32 %v558_v35, %v522_v37  ;;  %v553_v41 = vld [vmem:[%s687_s5 + $0x4] sm:$0xf] }
  0x2f   : > { %v498_v42 = vld [vmem:[%s687_s5 + $0x10] sm:$0xf0]  ;;  %v504_v43 = vld [vmem:[%s687_s5 + $0x8] sm:$0xf]  ;;  %v497_v44 = vor.u32 %v555_v39, %v496_v38  ;;  %v556_v45 = vld [vmem:[%s687_s5 + $0x14] sm:$0xf0] }
  0x30   : > { %311 = vmatpush.bf16.msra.mxu0 %v513_v31  ;;  %v554_v46 = vld [vmem:[%s687_s5 + $0xc] sm:$0xf]  ;;  %v506_v47 = vld [vmem:[%s687_s5 + $0x18] sm:$0xf0]  ;;  %325 = vmatpush.bf16.msra.mxu1 %v517_v32  ;;  %v501_v48 = vor.u32 %v553_v41, %v498_v42  ;;  %v505_v49 = vor.u32 %v556_v45, %v504_v43  ;;  %v552_v51 = vld [vmem:[%s748_s0] sm:$0xff]  ;;  %s565_s12 = sshll.u32 (%p669_p5), %s482_s15, 4 }
  0x31   : > { %339 = vmatpush.bf16.msra.mxu2 %v521_v36  ;;  %v509_v50 = vor.u32 %v554_v46, %v506_v47  ;;  %s402_s21 = scalar_lea.vmem (%p669_p5), %s751_s3, %s565_s12 }
  0x32   : > { %233 = vperm.xlu0 %593, %v225_v21   ;;  %353 = vmatpush.bf16.msra.mxu3 %v525_v40 }
  0x34   : > { %312 = vmatpush.bf16.msra.mxu0 %v497_v44  ;;  %326 = vmatpush.bf16.msra.mxu1 %v501_v48 }
  0x35   : > { %340 = vmatpush.bf16.msra.mxu2 %v505_v49 }
  0x36   : > { %354 = vmatpush.bf16.msra.mxu3 %v509_v50 }
  0x37   : > { %542 = vmatmul.msk.bf16.vlgmr.msra.gmra.mxu0 %vm301_vm0, %v552_v51  ;;  %543 = vmatmul.msk.bf16.vlgmr.msra.gmra.mxu1 %vm301_vm0, %v552_v51 }
  0x38   : > { %544 = vmatmul.msk.bf16.vlgmr.msra.gmra.mxu2 %vm301_vm0, %v552_v51 }
  0x39   : > { %545 = vmatmul.msk.bf16.vlgmr.msra.gmra.mxu3 %vm301_vm0, %v552_v51 }
  0x9c   : > { %v229_v52 = vpop.permute.xlu0 %228 }
  0xa4   : > { %v234_v62 = vpop.permute.xlu0 %233 }
  0xb4   : > { %v314_v53 = vpop.f32.mrf.mxu0  ;;  %v328_v55 = vpop.f32.mrf.mxu1 }
  0xb5   : > { %v315_v54 = vadd.f32 %v314_v53, %v229_v52  ;;  %v329_v56 = vadd.f32 %v328_v55, %v229_v52 }
  0xb7   : > { %vm361_vm1 = vcmp.gt.f32.partialorder %v315_v54, 0.0  ;;  %v369_v57 = vmul.f32 0.2, %v315_v54  ;;  %vm362_vm2 = vcmp.gt.f32.partialorder %v329_v56, 0.0  ;;  %v370_v58 = vmul.f32 0.2, %v329_v56 }
  0xb9   : > { %v377_v59 = vsel %vm361_vm1, %v315_v54, %v369_v57  ;;  %v378_v60 = vsel %vm362_vm2, %v329_v56, %v370_v58 }
  0xba   : > { %v385_v61 = vpack.c.bf16 %v378_v60, %v377_v59 }
  0xbb   : > { %v342_v63 = vpop.f32.mrf.mxu2 }
  0xbc   : > { %v343_v0 = vadd.f32 %v342_v63, %v229_v52  ;;  %v356_v1 = vpop.f32.mrf.mxu3  ;;  %v316_v2 = vpop.f32.mrf.mxu0  ;;  %389 = vst [vmem:[%s721_s11] sm:$0xff] %v385_v61 }
  0xbd   : > { %v357_v3 = vadd.f32 %v356_v1, %v229_v52  ;;  %v317_v4 = vadd.f32 %v316_v2, %v234_v62  ;;  %v330_v5 = vpop.f32.mrf.mxu1 }
  0xbe   : > { %vm363_vm3 = vcmp.gt.f32.partialorder %v343_v0, 0.0  ;;  %v371_v6 = vmul.f32 0.2, %v343_v0  ;;  %v331_v7 = vadd.f32 %v330_v5, %v234_v62 }
  0xbf   : > { %vm364_vm4 = vcmp.gt.f32.partialorder %v357_v3, 0.0  ;;  %v372_v8 = vmul.f32 0.2, %v357_v3  ;;  %vm365_vm5 = vcmp.gt.f32.partialorder %v317_v4, 0.0  ;;  %v373_v9 = vmul.f32 0.2, %v317_v4 }
  0xc0   : > { %v379_v10 = vsel %vm363_vm3, %v343_v0, %v371_v6  ;;  %vm366_vm6 = vcmp.gt.f32.partialorder %v331_v7, 0.0  ;;  %v374_v11 = vmul.f32 0.2, %v331_v7 }
  0xc1   : > { %v380_v12 = vsel %vm364_vm4, %v357_v3, %v372_v8  ;;  %v381_v13 = vsel %vm365_vm5, %v317_v4, %v373_v9 }
  0xc2   : > { %v386_v14 = vpack.c.bf16 %v380_v12, %v379_v10  ;;  %v382_v15 = vsel %vm366_vm6, %v331_v7, %v374_v11 }
  0xc3   : > { %v387_v16 = vpack.c.bf16 %v382_v15, %v381_v13  ;;  %v344_v17 = vpop.f32.mrf.mxu2  ;;  %v415_v26 = vld [vmem:[%s721_s11] sm:$0xff] (%p669_p5) }
  0xc4   : > { %390 = vst [vmem:[%s721_s11 + $0x8] sm:$0xff] %v386_v14  ;;  %v345_v18 = vadd.f32 %v344_v17, %v234_v62  ;;  %v358_v19 = vpop.f32.mrf.mxu3 }
  0xc5   : > { %391 = vst [vmem:[%s721_s11 + $0x10] sm:$0xff] %v387_v16  ;;  %v359_v20 = vadd.f32 %v358_v19, %v234_v62 }
  0xc6   : > { %vm367_vm7 = vcmp.gt.f32.partialorder %v345_v18, 0.0  ;;  %v375_v21 = vmul.f32 0.2, %v345_v18  ;;  %416 = vst [vmem:[%s402_s21] sm:$0xff] (%p669_p5), %v415_v26 }
  0xc7   : > { %vm368_vm8 = vcmp.gt.f32.partialorder %v359_v20, 0.0  ;;  %v376_v22 = vmul.f32 0.2, %v359_v20 }
  0xc8   : > { %v383_v23 = vsel %vm367_vm7, %v345_v18, %v375_v21  ;;  %399 = sbr.rel (!%p669_p5) target bundleno = 213 (0xd5), region = 59 }
  0xc9   : > { %v384_v24 = vsel %vm368_vm8, %v359_v20, %v376_v22 }
  0xca   : > { %v388_v25 = vpack.c.bf16 %v384_v24, %v383_v23 }
  0xcb   : > { %v417_v27 = vld [vmem:[%s721_s11 + $0x8] sm:$0xff] (%p669_p5) }
  0xcc   : > { %392 = vst [vmem:[%s721_s11 + $0x18] sm:$0xff] %v388_v25  ;;  %v419_v28 = vld [vmem:[%s721_s11 + $0x10] sm:$0xff] (%p669_p5) }
  0xcd   : > { %418 = vst [vmem:[%s402_s21 + $0x8] sm:$0xff] %v417_v27 }
  0xce   : > { %420 = vst [vmem:[%s402_s21 + $0x40] sm:$0xff] %v419_v28 }
  0xd3   : > { %v421_v29 = vld [vmem:[%s721_s11 + $0x18] sm:$0xff] }
  0xd4   : > { %422 = vst [vmem:[%s402_s21 + $0x48] sm:$0xff] %v421_v29 }
  0xd5 PF: > { %p10_p10 = scmp.ge.s32.totalorder %s656_s16, 6   ;;  %s753_s12 = smov %s612_s13 }
  0xd6   : > { %s754_s13 = smov %s667_s19  ;;  %s755_s14 = smov %s656_s16 }
  0xd7   :  { %12 = sbr.rel (!%p10_p10) target bundleno = 2 (0x2), region = 113 }

// kernel: critic_forward.5
= control target key start
LH: loop header
LB: loop body
LE: loop exit
PB: predicated region body
PF: predicated region fallthrough
CT: control target
= control target key end

     0   :  { %s822_s15 = smov 0   ;;  %s824_s16 = smov 0   ;;  %s949_s0 = inlined_call_operand.vmem [shape: bf16[16,128], index: 0, kind: input, shape index: {}]   ;;  %s950_s1 = inlined_call_operand.vmem [shape: bf16[128,512], index: 1, kind: input, shape index: {}]   ;;  %s951_s2 = inlined_call_operand.vmem [shape: bf16[16,512], index: 2, kind: output, shape index: {0}]   ;;  %s952_s3 = inlined_call_operand.vmem [shape: f32[2,16,1], index: 3, kind: output, shape index: {1}]   ;;  %s953_s4 = inlined_call_operand.vmem [shape: f32[2,16,1], index: 4, kind: output, shape index: {2}]  }
   0x1   :  { %s826_s17 = smov 0  }
   0x2 LB: > { %s838_s18 = sadd.s32 4294967295, %s795_s17   ;;  %s841_s19 = sadd.s32 1, %s795_s17   ;;  %s795_s17 = sphi %s826_s17, %s957_s17   ;;  %s791_s16 = sphi %s824_s16, %s956_s16   ;;  %s787_s15 = sphi %s822_s15, %s955_s15  }
   0x3   : > { %s40_s20 = ssub.s32 %s795_s17, %s841_s19  ;;  %s43_s21 = sadd.s32 1, %s791_s16 }
   0x4   : > { %p41_p0 = scmp.eq.s32.totalorder %s40_s20, 0  ;;  %p50_p1 = scmp.ne.s32.totalorder %s791_s16, %s787_s15 }
   0x5   : > { %p51_p2 = scmp.eq.s32.totalorder %s795_s17, 0  ;;  %p80_p3 = scmp.eq.s32.totalorder %s838_s18, 1 }
   0x6   : > { %s851_s22 = scalar_select %p41_p0, %s791_s16, %s43_s21  }
   0x7   : > { %p52_p4 = por %p51_p2, %p50_p1  ;;  %p853_p5 = por %p80_p3, %p50_p1 }
   0x8   : > { %p644_p6 = scmp.ge.s32.totalorder %s795_s17, 2 }
   0xa   : > { %157 = sbr.rel (%p644_p6) target bundleno = 35 (0x23), region = 20 }
   0xf   : > { %160 = sbr.rel (!%p52_p4) target bundleno = 35 (0x23), region = 24  ;;  %s162_s24 = sand.u32 (%p52_p4), 1, %s791_s16  }
  0x10   : > { %s728_s25 = sshll.u32 (%p52_p4), %s795_s17, 3  ;;  %s645_s26 = sshll.u32 (%p52_p4), %s162_s24, 7 }
  0x11   : > { %s863_s29 = scalar_lea.vmem (%p52_p4), %s950_s1, %s728_s25  ;;  %s164_s30 = scalar_lea.vmem (%p52_p4), [#allocation2], %s645_s26 }
  0x12   : > { %v226_v0 = vld [vmem:[%s863_s29] sm:$0xff] (%p52_p4)  ;;  %v228_v1 = vld [vmem:[%s863_s29 + $0x10] sm:$0xff] (%p52_p4) }
  0x13   : > { %v230_v2 = vld [vmem:[%s863_s29 + $0x20] sm:$0xff] (%p52_p4)  ;;  %227 = vst [vmem:[%s164_s30] sm:$0xff] (%p52_p4), %v226_v0  ;;  %v232_v3 = vld [vmem:[%s863_s29 + $0x30] sm:$0xff] (%p52_p4) }
  0x14   : > { %229 = vst [vmem:[%s164_s30 + $0x8] sm:$0xff] %v228_v1  ;;  %v234_v4 = vld [vmem:[%s863_s29 + $0x40] sm:$0xff]  ;;  %v236_v5 = vld [vmem:[%s863_s29 + $0x50] sm:$0xff] }
  0x15   : > { %231 = vst [vmem:[%s164_s30 + $0x10] sm:$0xff] %v230_v2  ;;  %v238_v6 = vld [vmem:[%s863_s29 + $0x60] sm:$0xff]  ;;  %v240_v7 = vld [vmem:[%s863_s29 + $0x70] sm:$0xff] }
  0x16   : > { %233 = vst [vmem:[%s164_s30 + $0x18] sm:$0xff] %v232_v3  ;;  %v242_v8 = vld [vmem:[%s863_s29 + $0x80] sm:$0xff]  ;;  %v244_v9 = vld [vmem:[%s863_s29 + $0x90] sm:$0xff] }
  0x17   : > { %235 = vst [vmem:[%s164_s30 + $0x20] sm:$0xff] %v234_v4  ;;  %v246_v10 = vld [vmem:[%s863_s29 + $0xa0] sm:$0xff]  ;;  %v248_v11 = vld [vmem:[%s863_s29 + $0xb0] sm:$0xff] }
  0x18   : > { %237 = vst [vmem:[%s164_s30 + $0x28] sm:$0xff] %v236_v5  ;;  %v250_v12 = vld [vmem:[%s863_s29 + $0xc0] sm:$0xff]  ;;  %v252_v13 = vld [vmem:[%s863_s29 + $0xd0] sm:$0xff] }
  0x19   : > { %239 = vst [vmem:[%s164_s30 + $0x30] sm:$0xff] %v238_v6  ;;  %v254_v14 = vld [vmem:[%s863_s29 + $0xe0] sm:$0xff]  ;;  %v256_v15 = vld [vmem:[%s863_s29 + $0xf0] sm:$0xff] }
  0x1a   : > { %241 = vst [vmem:[%s164_s30 + $0x38] sm:$0xff] %v240_v7 }
  0x1b   : > { %243 = vst [vmem:[%s164_s30 + $0x40] sm:$0xff] %v242_v8 }
  0x1c   : > { %245 = vst [vmem:[%s164_s30 + $0x48] sm:$0xff] %v244_v9 }
  0x1d   : > { %247 = vst [vmem:[%s164_s30 + $0x50] sm:$0xff] %v246_v10 }
  0x1e   : > { %249 = vst [vmem:[%s164_s30 + $0x58] sm:$0xff] %v248_v11 }
  0x1f   : > { %251 = vst [vmem:[%s164_s30 + $0x60] sm:$0xff] %v250_v12 }
  0x20   : > { %253 = vst [vmem:[%s164_s30 + $0x68] sm:$0xff] %v252_v13 }
  0x21   : > { %255 = vst [vmem:[%s164_s30 + $0x70] sm:$0xff] %v254_v14 }
  0x22   : > { %257 = vst [vmem:[%s164_s30 + $0x78] sm:$0xff] %v256_v15 }
  0x23 PF: > { %p648_p7 = scmp.ge.s32.totalorder %s795_s17, 1  ;;  %p262_p8 = scmp.lt.s32.totalorder %s795_s17, 3 }
  0x25   : > { %p263_p9 = pnand %p648_p7, %p262_p8 }
  0x26   : > { %s269_s5 = sand.u32 (!%p263_p9), 1, %s787_s15   ;;  %p305_p10 = scmp.lt.s32.totalorder (!%p263_p9), %s838_s18, 1 }
  0x27   : > { %266 = sbr.rel (%p263_p9) target bundleno = 334 (0x14e), region = 62  ;;  %s649_s6 = sshll.u32 (!%p263_p9), %s269_s5, 7 }
  0x28   : > { %s886_s7 = scalar_lea.vmem (!%p263_p9), [#allocation2], %s649_s6  ;;  %s650_s10 = sshll.u32 (!%p263_p9), %s269_s5, 4 }
  0x29   : > { %s288_s11 = scalar_lea.vmem (!%p263_p9), [#allocation3], %s650_s10 }
  0x2c   : > { %v717_v16 = vld [vmem:[%s886_s7 + $0x70] sm:$0xf]  ;;  %v747_v17 = vld [vmem:[%s886_s7 + $0x74] sm:$0xf0]  ;;  %v746_v18 = vld [vmem:[%s886_s7 + $0x74] sm:$0xf] }
  0x2d   : > { %v718_v19 = vor.u32 %v747_v17, %v717_v16  ;;  %v719_v20 = vld [vmem:[%s886_s7 + $0x78] sm:$0xf0]  ;;  %v709_v21 = vld [vmem:[%s886_s7 + $0x60] sm:$0xf]  ;;  %v745_v22 = vld [vmem:[%s886_s7 + $0x64] sm:$0xf0] }
  0x2e   : > { %v722_v23 = vor.u32 %v746_v18, %v719_v20  ;;  %v744_v24 = vld [vmem:[%s886_s7 + $0x64] sm:$0xf]  ;;  %v711_v25 = vld [vmem:[%s886_s7 + $0x68] sm:$0xf0]  ;;  %v710_v26 = vor.u32 %v745_v22, %v709_v21  ;;  %v701_v28 = vld [vmem:[%s886_s7 + $0x50] sm:$0xf] }
  0x2f   : > { %419 = vmatpush.bf16.msra.mxu0 %v718_v19  ;;  %v714_v27 = vor.u32 %v744_v24, %v711_v25  ;;  %v743_v29 = vld [vmem:[%s886_s7 + $0x54] sm:$0xf0]  ;;  %v742_v30 = vld [vmem:[%s886_s7 + $0x54] sm:$0xf]  ;;  %v703_v31 = vld [vmem:[%s886_s7 + $0x58] sm:$0xf0] }
  0x30   : > { %433 = vmatpush.bf16.msra.mxu1 %v722_v23  ;;  %v702_v32 = vor.u32 %v743_v29, %v701_v28  ;;  %v706_v33 = vor.u32 %v742_v30, %v703_v31  ;;  %v693_v34 = vld [vmem:[%s886_s7 + $0x40] sm:$0xf]  ;;  %v741_v35 = vld [vmem:[%s886_s7 + $0x44] sm:$0xf0]  ;;  %v740_v36 = vld [vmem:[%s886_s7 + $0x44] sm:$0xf] }
  0x31   : > { %v695_v37 = vld [vmem:[%s886_s7 + $0x48] sm:$0xf0]  ;;  %v694_v38 = vor.u32 %v741_v35, %v693_v34  ;;  %v685_v40 = vld [vmem:[%s886_s7 + $0x30] sm:$0xf]  ;;  %v739_v41 = vld [vmem:[%s886_s7 + $0x34] sm:$0xf0] }
  0x32   : > { %v698_v39 = vor.u32 %v740_v36, %v695_v37  ;;  %v738_v42 = vld [vmem:[%s886_s7 + $0x34] sm:$0xf]  ;;  %v687_v43 = vld [vmem:[%s886_s7 + $0x38] sm:$0xf0]  ;;  %v686_v44 = vor.u32 %v739_v41, %v685_v40  ;;  %v677_v46 = vld [vmem:[%s886_s7 + $0x20] sm:$0xf] }
  0x33   : > { %420 = vmatpush.bf16.msra.mxu0 %v710_v26  ;;  %v690_v45 = vor.u32 %v738_v42, %v687_v43  ;;  %v737_v47 = vld [vmem:[%s886_s7 + $0x24] sm:$0xf0]  ;;  %v736_v48 = vld [vmem:[%s886_s7 + $0x24] sm:$0xf]  ;;  %v679_v49 = vld [vmem:[%s886_s7 + $0x28] sm:$0xf0] }
  0x34   : > { %434 = vmatpush.bf16.msra.mxu1 %v714_v27  ;;  %v678_v50 = vor.u32 %v737_v47, %v677_v46  ;;  %v682_v51 = vor.u32 %v736_v48, %v679_v49  ;;  %v669_v52 = vld [vmem:[%s886_s7 + $0x10] sm:$0xf]  ;;  %v735_v53 = vld [vmem:[%s886_s7 + $0x14] sm:$0xf0]  ;;  %v734_v54 = vld [vmem:[%s886_s7 + $0x14] sm:$0xf] }
  0x35   : > { %v671_v55 = vld [vmem:[%s886_s7 + $0x18] sm:$0xf0]  ;;  %v670_v56 = vor.u32 %v735_v53, %v669_v52  ;;  %v661_v58 = vld [vmem:[%s886_s7] sm:$0xf]  ;;  %v733_v59 = vld [vmem:[%s886_s7 + $0x4] sm:$0xf0] }
  0x36   : > { %v674_v57 = vor.u32 %v734_v54, %v671_v55  ;;  %v732_v60 = vld [vmem:[%s886_s7 + $0x4] sm:$0xf]  ;;  %v663_v61 = vld [vmem:[%s886_s7 + $0x8] sm:$0xf0]  ;;  %v662_v62 = vor.u32 %v733_v59, %v661_v58  ;;  %s306_s12 = scalar_select %p305_p10, %s838_s18, 1  ;;  %vm457_vm0 = vcmask 7168  }
  0x37   : > { %421 = vmatpush.bf16.msra.mxu0 %v702_v32  ;;  %v666_v63 = vor.u32 %v732_v60, %v663_v61  ;;  %v731_v0 = vld [vmem:[%s949_s0] sm:$0xff]  ;;  %s748_s25 = sshll.u32 (%p853_p5), %s838_s18, 3 }
  0x38   : > { %435 = vmatpush.bf16.msra.mxu1 %v706_v33  ;;  %s729_s13 = sshll.u32 %s306_s12, 4  ;;  %s491_s28 = scalar_lea.vmem (%p853_p5), %s951_s2, %s748_s25 }
  0x39   : > { %s309_s17 = scalar_lea.vmem %s952_s3, %s729_s13  ;;  %s314_s24 = scalar_lea.vmem %s953_s4, %s729_s13 }
  0x3b   : > { %422 = vmatpush.bf16.msra.mxu0 %v694_v38 }
  0x3c   : > { %436 = vmatpush.bf16.msra.mxu1 %v698_v39 }
  0x3f   : > { %423 = vmatpush.bf16.msra.mxu0 %v686_v44 }
  0x40   : > { %437 = vmatpush.bf16.msra.mxu1 %v690_v45 }
  0x43   : > { %424 = vmatpush.bf16.msra.mxu0 %v678_v50 }
  0x44   : > { %438 = vmatpush.bf16.msra.mxu1 %v682_v51 }
  0x47   : > { %425 = vmatpush.bf16.msra.mxu0 %v670_v56 }
  0x48   : > { %439 = vmatpush.bf16.msra.mxu1 %v674_v57 }
  0x4b   : > { %426 = vmatpush.bf16.msra.mxu0 %v662_v62 }
  0x4c   : > { %440 = vmatpush.bf16.msra.mxu1 %v666_v63 }
  0x4e   : > { %427 = vmatmul.bf16.vlgmr.msra.gmra.mxu0 %v731_v0 }
  0x4f   : > { %441 = vmatmul.bf16.vlgmr.msra.gmra.mxu1 %v731_v0 }
  0xcb   : > { %v428_v1 = vpop.f32.mrf.mxu0 }
  0xcc   : > { %v442_v2 = vpop.f32.mrf.mxu1  ;;  %v460_v3 = vmul.f32 %v428_v1, %v428_v1 }
  0xcd   : > { %v447_v4 = vpack.c.bf16 %v442_v2, %v428_v1  ;;  %v451_v5 = vadd.f32 %v442_v2, %v428_v1  ;;  %v461_v6 = vmul.f32 %v442_v2, %v442_v2 }
  0xcf   : > { %452 = vadd.xlane.f32.xlu0 %v451_v5  ;;  %v464_v7 = vadd.f32 %v461_v6, %v460_v3  ;;  %449 = vst [vmem:[%s288_s11] sm:$0xff] %v447_v4 }
  0xd1   : > { %465 = vadd.xlane.f32.xlu1 %v464_v7 }
  0xd3   : > { %v430_v8 = vpop.f32.mrf.mxu0 }
  0xd4   : > { %v462_v9 = vmul.f32 %v430_v8, %v430_v8  ;;  %v444_v10 = vpop.f32.mrf.mxu1 }
  0xd5   : > { %v448_v11 = vpack.c.bf16 %v444_v10, %v430_v8  ;;  %v463_v12 = vmul.f32 %v444_v10, %v444_v10  ;;  %v454_v13 = vadd.f32 %v444_v10, %v430_v8 }
  0xd6   : > { %v522_v19 = vld [vmem:[%s288_s11] sm:$0xff] (%p853_p5) }
  0xd7   : > { %450 = vst [vmem:[%s288_s11 + $0x8] sm:$0xff] %v448_v11  ;;  %455 = vadd.xlane.f32.xlu0 %v454_v13  ;;  %v467_v14 = vadd.f32 %v463_v12, %v462_v9 }
  0xd8   : > { %523 = vst [vmem:[%s491_s28] sm:$0xff] (%p853_p5), %v522_v19 }
  0xd9   : > { %468 = vadd.xlane.f32.xlu1 %v467_v14 }
  0xde   : > { %v524_v20 = vld [vmem:[%s288_s11 + $0x8] sm:$0xff] (%p853_p5) }
  0xdf   : > { %525 = vst [vmem:[%s491_s28 + $0x10] sm:$0xff] (%p853_p5), %v524_v20 }
 0x142   : > { %v453_v15 = vpop.xlane.xlu0 %452 }
 0x143   : > { %458 = vst.msk [vmem:[%s309_s17] sm:$0xff] %vm457_vm0, %v453_v15 }
 0x144   : > { %v466_v16 = vpop.xlane.xlu1 %465 }
 0x145   : > { %470 = vst.msk [vmem:[%s314_s24] sm:$0xff] %vm457_vm0, %v466_v16 }
 0x149   : > { %488 = sbr.rel (!%p853_p5) target bundleno = 334 (0x14e), region = 70 }
 0x14a   : > { %v456_v17 = vpop.xlane.xlu0 %455 }
 0x14b   : > { %459 = vst.msk [vmem:[%s309_s17 + $0x8] sm:$0xff] %vm457_vm0, %v456_v17 }
 0x14c   : > { %v469_v18 = vpop.xlane.xlu1 %468 }
 0x14d   : > { %471 = vst.msk [vmem:[%s314_s24 + $0x8] sm:$0xff] %vm457_vm0, %v469_v18 }
 0x14e PF: > { %p12_p11 = scmp.ge.s32.totalorder %s841_s19, 4   ;;  %s955_s15 = smov %s791_s16 }
 0x14f   : > { %s956_s16 = smov %s851_s22  ;;  %s957_s17 = smov %s841_s19 }
 0x150   :  { %14 = sbr.rel (!%p12_p11) target bundleno = 2 (0x2), region = 163 }

// kernel: critic_forward.6
= control target key start
LH: loop header
LB: loop body
LE: loop exit
PB: predicated region body
PF: predicated region fallthrough
CT: control target
= control target key end

     0   :  { %vm220_vm0 = vcmask 7168   ;;  %s515_s1 = inlined_call_operand.vmem [shape: bf16[256,128], index: 1, kind: input, shape index: {}]   ;;  %s516_s0 = inlined_call_operand.vmem [shape: bf16[32,256], index: 0, kind: input, shape index: {}]   ;;  %s517_s2 = inlined_call_operand.vmem [shape: bf16[32,128], index: 2, kind: output, shape index: {0}]   ;;  %s518_s3 = inlined_call_operand.vmem [shape: f32[1,32,1], index: 3, kind: output, shape index: {1}]   ;;  %s519_s4 = inlined_call_operand.vmem [shape: f32[1,32,1], index: 4, kind: output, shape index: {2}]  }
   0x1   :  { %v344_v0 = vld [vmem:[%s515_s1 + $0x38] sm:$0xff]  ;;  %v343_v2 = vld [vmem:[%s515_s1 + $0x30] sm:$0xff]  ;;  %v342_v4 = vld [vmem:[%s515_s1 + $0x28] sm:$0xff] }
   0x2   :  { %v352_v1 = vld [vmem:[%s515_s1 + $0x78] sm:$0xff]  ;;  %166 = vmatpush.bf16.msra.mxu0 %v344_v0  ;;  %364 = vmatpush.bf16.msra.mxu2 %v344_v0  ;;  %v351_v3 = vld [vmem:[%s515_s1 + $0x70] sm:$0xff]  ;;  %v350_v5 = vld [vmem:[%s515_s1 + $0x68] sm:$0xff] }
   0x3   :  { %185 = vmatpush.bf16.msra.mxu1 %v352_v1  ;;  %372 = vmatpush.bf16.msra.mxu3 %v352_v1  ;;  %v341_v6 = vld [vmem:[%s515_s1 + $0x20] sm:$0xff]  ;;  %v340_v8 = vld [vmem:[%s515_s1 + $0x18] sm:$0xff]  ;;  %v339_v10 = vld [vmem:[%s515_s1 + $0x10] sm:$0xff] }
   0x4   :  { %v349_v7 = vld [vmem:[%s515_s1 + $0x60] sm:$0xff]  ;;  %v348_v9 = vld [vmem:[%s515_s1 + $0x58] sm:$0xff]  ;;  %v347_v11 = vld [vmem:[%s515_s1 + $0x50] sm:$0xff] }
   0x5   :  { %v338_v12 = vld [vmem:[%s515_s1 + $0x8] sm:$0xff]  ;;  %v337_v14 = vld [vmem:[%s515_s1] sm:$0xff]  ;;  %v263_v18 = vld [vmem:[%s516_s0 + $0x10] sm:$0xf] }
   0x6   :  { %167 = vmatpush.bf16.msra.mxu0 %v343_v2  ;;  %365 = vmatpush.bf16.msra.mxu2 %v343_v2  ;;  %v346_v13 = vld [vmem:[%s515_s1 + $0x48] sm:$0xff]  ;;  %v345_v15 = vld [vmem:[%s515_s1 + $0x40] sm:$0xff]  ;;  %v336_v19 = vld [vmem:[%s516_s0 + $0x14] sm:$0xf0] }
   0x7   :  { %186 = vmatpush.bf16.msra.mxu1 %v351_v3  ;;  %373 = vmatpush.bf16.msra.mxu3 %v351_v3  ;;  %v255_v16 = vld [vmem:[%s516_s0] sm:$0xf]  ;;  %v334_v17 = vld [vmem:[%s516_s0 + $0x4] sm:$0xf0]  ;;  %v333_v20 = vld [vmem:[%s516_s0 + $0x4] sm:$0xf]  ;;  %v264_v25 = vor.u32 %v336_v19, %v263_v18 }
   0x8   :  { %v257_v21 = vld [vmem:[%s516_s0 + $0x8] sm:$0xf0]  ;;  %v335_v22 = vld [vmem:[%s516_s0 + $0x14] sm:$0xf]  ;;  %v265_v23 = vld [vmem:[%s516_s0 + $0x18] sm:$0xf0]  ;;  %v256_v24 = vor.u32 %v334_v17, %v255_v16 }
   0x9   :  { %v260_v26 = vor.u32 %v333_v20, %v257_v21  ;;  %v268_v27 = vor.u32 %v335_v22, %v265_v23 }
   0xa   :  { %168 = vmatpush.bf16.msra.mxu0 %v342_v4  ;;  %366 = vmatpush.bf16.msra.mxu2 %v342_v4 }
   0xb   :  { %187 = vmatpush.bf16.msra.mxu1 %v350_v5  ;;  %374 = vmatpush.bf16.msra.mxu3 %v350_v5 }
   0xe   :  { %169 = vmatpush.bf16.msra.mxu0 %v341_v6  ;;  %367 = vmatpush.bf16.msra.mxu2 %v341_v6 }
   0xf   :  { %188 = vmatpush.bf16.msra.mxu1 %v349_v7  ;;  %375 = vmatpush.bf16.msra.mxu3 %v349_v7 }
  0x12   :  { %170 = vmatpush.bf16.msra.mxu0 %v340_v8  ;;  %368 = vmatpush.bf16.msra.mxu2 %v340_v8 }
  0x13   :  { %189 = vmatpush.bf16.msra.mxu1 %v348_v9  ;;  %376 = vmatpush.bf16.msra.mxu3 %v348_v9 }
  0x16   :  { %171 = vmatpush.bf16.msra.mxu0 %v339_v10  ;;  %369 = vmatpush.bf16.msra.mxu2 %v339_v10 }
  0x17   :  { %190 = vmatpush.bf16.msra.mxu1 %v347_v11  ;;  %377 = vmatpush.bf16.msra.mxu3 %v347_v11 }
  0x1a   :  { %172 = vmatpush.bf16.msra.mxu0 %v338_v12  ;;  %370 = vmatpush.bf16.msra.mxu2 %v338_v12 }
  0x1b   :  { %191 = vmatpush.bf16.msra.mxu1 %v346_v13  ;;  %378 = vmatpush.bf16.msra.mxu3 %v346_v13 }
  0x1e   :  { %173 = vmatpush.bf16.msra.mxu0 %v337_v14  ;;  %371 = vmatpush.bf16.msra.mxu2 %v337_v14 }
  0x1f   :  { %192 = vmatpush.bf16.msra.mxu1 %v345_v15  ;;  %379 = vmatpush.bf16.msra.mxu3 %v345_v15 }
  0x21   :  { %174 = vmatmul.bf16.vlgmr.msra.gmra.mxu0 %v256_v24  ;;  %179 = vmatmul.bf16.vlgmr.msra.gmra.mxu2 %v264_v25 }
  0x22   :  { %193 = vmatmul.bf16.vlgmr.msra.gmra.mxu1 %v260_v26  ;;  %198 = vmatmul.bf16.vlgmr.msra.gmra.mxu3 %v268_v27 }
  0x9e   :  { %v175_v28 = vpop.f32.mrf.mxu0 }
  0x9f   :  { %v194_v29 = vpop.f32.mrf.mxu1 }
  0xa0   :  { %v195_v30 = vadd.f32 %v194_v29, %v175_v28 }
  0xa2   :  { %212 = vadd.xlane.f32.xlu0 %v195_v30  ;;  %v225_v31 = vmul.f32 %v195_v30, %v195_v30 }
  0xa4   :  { %229 = vadd.xlane.f32.xlu2 %v225_v31  ;;  %v180_v32 = vpop.f32.mrf.mxu2 }
  0xa5   :  { %v199_v33 = vpop.f32.mrf.mxu3 }
  0xa6   :  { %v200_v34 = vadd.f32 %v199_v33, %v180_v32  ;;  %v177_v35 = vpop.f32.mrf.mxu0 }
  0xa7   :  { %v196_v36 = vpop.f32.mrf.mxu1 }
  0xa8   :  { %v197_v37 = vadd.f32 %v196_v36, %v177_v35  ;;  %216 = vadd.xlane.f32.xlu1 %v200_v34  ;;  %v227_v44 = vmul.f32 %v200_v34, %v200_v34 }
  0xaa   :  { %v356_v38 = vpack.c.bf16 %v197_v37, %v195_v30  ;;  %214 = vadd.xlane.f32.xlu0 %v197_v37  ;;  %v226_v39 = vmul.f32 %v197_v37, %v197_v37 }
  0xac   :  { %357 = vst [vmem:[%s517_s2] sm:$0xff] %v356_v38   ;;  %231 = vadd.xlane.f32.xlu2 %v226_v39  ;;  %v182_v40 = vpop.f32.mrf.mxu2 }
  0xad   :  { %v201_v41 = vpop.f32.mrf.mxu3 }
  0xae   :  { %v202_v42 = vadd.f32 %v201_v41, %v182_v40 }
  0xb0   :  { %v361_v43 = vpack.c.bf16 %v202_v42, %v200_v34  ;;  %218 = vadd.xlane.f32.xlu1 %v202_v42  ;;  %v228_v45 = vmul.f32 %v202_v42, %v202_v42 }
  0xb2   :  { %363 = vst [vmem:[%s517_s2 + $0x8] sm:$0xff] %v361_v43   ;;  %233 = vadd.xlane.f32.xlu0 %v227_v44 }
  0xb8   :  { %235 = vadd.xlane.f32.xlu1 %v228_v45 }
 0x115   :  { %v213_v46 = vpop.xlane.xlu0 %212 }
 0x116   :  { %221 = vst.msk [vmem:[%s518_s3] sm:$0xff] %vm220_vm0, %v213_v46 }
 0x117   :  { %v230_v47 = vpop.xlane.xlu2 %229 }
 0x118   :  { %237 = vst.msk [vmem:[%s519_s4] sm:$0xff] %vm220_vm0, %v230_v47 }
 0x11b   :  { %v217_v48 = vpop.xlane.xlu1 %216 }
 0x11c   :  { %223 = vst.msk [vmem:[%s518_s3 + $0x10] sm:$0xff] %vm220_vm0, %v217_v48 }
 0x11d   :  { %v215_v49 = vpop.xlane.xlu0 %214 }
 0x11e   :  { %222 = vst.msk [vmem:[%s518_s3 + $0x8] sm:$0xff] %vm220_vm0, %v215_v49 }
 0x11f   :  { %v232_v50 = vpop.xlane.xlu2 %231 }
 0x120   :  { %238 = vst.msk [vmem:[%s519_s4 + $0x8] sm:$0xff] %vm220_vm0, %v232_v50 }
 0x123   :  { %v219_v51 = vpop.xlane.xlu1 %218 }
 0x124   :  { %224 = vst.msk [vmem:[%s518_s3 + $0x18] sm:$0xff] %vm220_vm0, %v219_v51 }
 0x125   :  { %v234_v52 = vpop.xlane.xlu0 %233 }
 0x126   :  { %239 = vst.msk [vmem:[%s519_s4 + $0x10] sm:$0xff] %vm220_vm0, %v234_v52 }
 0x12b   :  { %v236_v53 = vpop.xlane.xlu1 %235 }
 0x12c   :  { %240 = vst.msk [vmem:[%s519_s4 + $0x18] sm:$0xff] %vm220_vm0, %v236_v53 }

// kernel: critic_forward.7
= control target key start
LH: loop header
LB: loop body
LE: loop exit
PB: predicated region body
PF: predicated region fallthrough
CT: control target
= control target key end

     0   :  { %vm514_vm0 = vcmask 7168   ;;  %s1123_s1 = inlined_call_operand.vmem [shape: bf16[512,128], index: 1, kind: input, shape index: {}]   ;;  %s1124_s0 = inlined_call_operand.vmem [shape: bf16[64,512], index: 0, kind: input, shape index: {}]   ;;  %s1125_s2 = inlined_call_operand.vmem [shape: bf16[64,128], index: 2, kind: output, shape index: {0}]   ;;  %s1126_s3 = inlined_call_operand.vmem [shape: f32[1,64,1], index: 3, kind: output, shape index: {1}]   ;;  %s1127_s4 = inlined_call_operand.vmem [shape: f32[1,64,1], index: 4, kind: output, shape index: {2}]  }
   0x1   :  { %v782_v0 = vld [vmem:[%s1123_s1 + $0x38] sm:$0xff]  ;;  %v781_v4 = vld [vmem:[%s1123_s1 + $0x30] sm:$0xff]  ;;  %v780_v8 = vld [vmem:[%s1123_s1 + $0x28] sm:$0xff] }
   0x2   :  { %v790_v1 = vld [vmem:[%s1123_s1 + $0x78] sm:$0xff]  ;;  %366 = vmatpush.bf16.msra.mxu0 %v782_v0  ;;  %v789_v5 = vld [vmem:[%s1123_s1 + $0x70] sm:$0xff]  ;;  %v788_v9 = vld [vmem:[%s1123_s1 + $0x68] sm:$0xff] }
   0x3   :  { %v798_v2 = vld [vmem:[%s1123_s1 + $0xb8] sm:$0xff]  ;;  %395 = vmatpush.bf16.msra.mxu1 %v790_v1  ;;  %v797_v6 = vld [vmem:[%s1123_s1 + $0xb0] sm:$0xff]  ;;  %v796_v10 = vld [vmem:[%s1123_s1 + $0xa8] sm:$0xff] }
   0x4   :  { %v806_v3 = vld [vmem:[%s1123_s1 + $0xf8] sm:$0xff]  ;;  %424 = vmatpush.bf16.msra.mxu2 %v798_v2  ;;  %v805_v7 = vld [vmem:[%s1123_s1 + $0xf0] sm:$0xff]  ;;  %v804_v11 = vld [vmem:[%s1123_s1 + $0xe8] sm:$0xff] }
   0x5   :  { %453 = vmatpush.bf16.msra.mxu3 %v806_v3  ;;  %v779_v12 = vld [vmem:[%s1123_s1 + $0x20] sm:$0xff]  ;;  %v778_v16 = vld [vmem:[%s1123_s1 + $0x18] sm:$0xff]  ;;  %v777_v20 = vld [vmem:[%s1123_s1 + $0x10] sm:$0xff] }
   0x6   :  { %367 = vmatpush.bf16.msra.mxu0 %v781_v4  ;;  %v787_v13 = vld [vmem:[%s1123_s1 + $0x60] sm:$0xff]  ;;  %v786_v17 = vld [vmem:[%s1123_s1 + $0x58] sm:$0xff]  ;;  %v785_v21 = vld [vmem:[%s1123_s1 + $0x50] sm:$0xff] }
   0x7   :  { %396 = vmatpush.bf16.msra.mxu1 %v789_v5  ;;  %v795_v14 = vld [vmem:[%s1123_s1 + $0xa0] sm:$0xff]  ;;  %v794_v18 = vld [vmem:[%s1123_s1 + $0x98] sm:$0xff]  ;;  %v793_v22 = vld [vmem:[%s1123_s1 + $0x90] sm:$0xff] }
   0x8   :  { %425 = vmatpush.bf16.msra.mxu2 %v797_v6  ;;  %v803_v15 = vld [vmem:[%s1123_s1 + $0xe0] sm:$0xff]  ;;  %v802_v19 = vld [vmem:[%s1123_s1 + $0xd8] sm:$0xff]  ;;  %v801_v23 = vld [vmem:[%s1123_s1 + $0xd0] sm:$0xff] }
   0x9   :  { %454 = vmatpush.bf16.msra.mxu3 %v805_v7  ;;  %v776_v24 = vld [vmem:[%s1123_s1 + $0x8] sm:$0xff]  ;;  %v775_v28 = vld [vmem:[%s1123_s1] sm:$0xff]  ;;  %v761_v33 = vld [vmem:[%s1124_s0 + $0xc] sm:$0xf0] }
   0xa   :  { %368 = vmatpush.bf16.msra.mxu0 %v780_v8  ;;  %v784_v25 = vld [vmem:[%s1123_s1 + $0x48] sm:$0xff]  ;;  %v783_v29 = vld [vmem:[%s1123_s1 + $0x40] sm:$0xff]  ;;  %v571_v35 = vld [vmem:[%s1124_s0 + $0x10] sm:$0xf0] }
   0xb   :  { %397 = vmatpush.bf16.msra.mxu1 %v788_v9  ;;  %v792_v26 = vld [vmem:[%s1123_s1 + $0x88] sm:$0xff]  ;;  %v791_v30 = vld [vmem:[%s1123_s1 + $0x80] sm:$0xff]  ;;  %v762_v37 = vld [vmem:[%s1124_s0 + $0x14] sm:$0xf0] }
   0xc   :  { %426 = vmatpush.bf16.msra.mxu2 %v796_v10  ;;  %v800_v27 = vld [vmem:[%s1123_s1 + $0xc8] sm:$0xff]  ;;  %v799_v31 = vld [vmem:[%s1123_s1 + $0xc0] sm:$0xff]  ;;  %v579_v39 = vld [vmem:[%s1124_s0 + $0x18] sm:$0xf0] }
   0xd   :  { %455 = vmatpush.bf16.msra.mxu3 %v804_v11  ;;  %v569_v32 = vld [vmem:[%s1124_s0] sm:$0xf]  ;;  %v759_v34 = vld [vmem:[%s1124_s0 + $0x4] sm:$0xf]  ;;  %v577_v36 = vld [vmem:[%s1124_s0 + $0x8] sm:$0xf] }
   0xe   :  { %369 = vmatpush.bf16.msra.mxu0 %v779_v12  ;;  %v760_v38 = vld [vmem:[%s1124_s0 + $0xc] sm:$0xf]  ;;  %v570_v40 = vor.u32 %v761_v33, %v569_v32  ;;  %v574_v41 = vor.u32 %v759_v34, %v571_v35  ;;  %v578_v42 = vor.u32 %v762_v37, %v577_v36  ;;  %v585_v44 = vld [vmem:[%s1124_s0 + $0x20] sm:$0xf]  ;;  %v765_v45 = vld [vmem:[%s1124_s0 + $0x2c] sm:$0xf0] }
   0xf   :  { %398 = vmatpush.bf16.msra.mxu1 %v787_v13  ;;  %v582_v43 = vor.u32 %v760_v38, %v579_v39  ;;  %v763_v46 = vld [vmem:[%s1124_s0 + $0x24] sm:$0xf]  ;;  %v587_v47 = vld [vmem:[%s1124_s0 + $0x30] sm:$0xf0]  ;;  %v593_v48 = vld [vmem:[%s1124_s0 + $0x28] sm:$0xf]  ;;  %v586_v52 = vor.u32 %v765_v45, %v585_v44 }
  0x10   :  { %427 = vmatpush.bf16.msra.mxu2 %v795_v14  ;;  %v766_v49 = vld [vmem:[%s1124_s0 + $0x34] sm:$0xf0]  ;;  %v764_v50 = vld [vmem:[%s1124_s0 + $0x2c] sm:$0xf]  ;;  %v595_v51 = vld [vmem:[%s1124_s0 + $0x38] sm:$0xf0]  ;;  %v590_v53 = vor.u32 %v763_v46, %v587_v47 }
  0x11   :  { %456 = vmatpush.bf16.msra.mxu3 %v803_v15  ;;  %v594_v54 = vor.u32 %v766_v49, %v593_v48  ;;  %v598_v55 = vor.u32 %v764_v50, %v595_v51  ;;  %v601_v56 = vld [vmem:[%s1124_s0 + $0x40] sm:$0xf]  ;;  %v769_v57 = vld [vmem:[%s1124_s0 + $0x4c] sm:$0xf0]  ;;  %v767_v58 = vld [vmem:[%s1124_s0 + $0x44] sm:$0xf] }
  0x12   :  { %370 = vmatpush.bf16.msra.mxu0 %v778_v16  ;;  %v603_v59 = vld [vmem:[%s1124_s0 + $0x50] sm:$0xf0]  ;;  %v609_v60 = vld [vmem:[%s1124_s0 + $0x48] sm:$0xf]  ;;  %v770_v61 = vld [vmem:[%s1124_s0 + $0x54] sm:$0xf0]  ;;  %v602_v0 = vor.u32 %v769_v57, %v601_v56 }
  0x13   :  { %399 = vmatpush.bf16.msra.mxu1 %v786_v17  ;;  %v768_v62 = vld [vmem:[%s1124_s0 + $0x4c] sm:$0xf]  ;;  %v611_v63 = vld [vmem:[%s1124_s0 + $0x58] sm:$0xf0]  ;;  %v606_v1 = vor.u32 %v767_v58, %v603_v59  ;;  %v610_v2 = vor.u32 %v770_v61, %v609_v60  ;;  %v617_v4 = vld [vmem:[%s1124_s0 + $0x60] sm:$0xf] }
  0x14   :  { %428 = vmatpush.bf16.msra.mxu2 %v794_v18  ;;  %v614_v3 = vor.u32 %v768_v62, %v611_v63  ;;  %v773_v5 = vld [vmem:[%s1124_s0 + $0x6c] sm:$0xf0]  ;;  %v771_v6 = vld [vmem:[%s1124_s0 + $0x64] sm:$0xf]  ;;  %v619_v7 = vld [vmem:[%s1124_s0 + $0x70] sm:$0xf0] }
  0x15   :  { %457 = vmatpush.bf16.msra.mxu3 %v802_v19  ;;  %v625_v8 = vld [vmem:[%s1124_s0 + $0x68] sm:$0xf]  ;;  %v774_v9 = vld [vmem:[%s1124_s0 + $0x74] sm:$0xf0]  ;;  %v772_v10 = vld [vmem:[%s1124_s0 + $0x6c] sm:$0xf]  ;;  %v618_v12 = vor.u32 %v773_v5, %v617_v4  ;;  %v622_v13 = vor.u32 %v771_v6, %v619_v7 }
  0x16   :  { %371 = vmatpush.bf16.msra.mxu0 %v777_v20  ;;  %v627_v11 = vld [vmem:[%s1124_s0 + $0x78] sm:$0xf0]  ;;  %v626_v14 = vor.u32 %v774_v9, %v625_v8 }
  0x17   :  { %400 = vmatpush.bf16.msra.mxu1 %v785_v21  ;;  %v630_v15 = vor.u32 %v772_v10, %v627_v11 }
  0x18   :  { %429 = vmatpush.bf16.msra.mxu2 %v793_v22 }
  0x19   :  { %458 = vmatpush.bf16.msra.mxu3 %v801_v23 }
  0x1a   :  { %372 = vmatpush.bf16.msra.mxu0 %v776_v24 }
  0x1b   :  { %401 = vmatpush.bf16.msra.mxu1 %v784_v25 }
  0x1c   :  { %430 = vmatpush.bf16.msra.mxu2 %v792_v26 }
  0x1d   :  { %459 = vmatpush.bf16.msra.mxu3 %v800_v27 }
  0x1e   :  { %373 = vmatpush.bf16.msra.mxu0 %v775_v28 }
  0x1f   :  { %402 = vmatpush.bf16.msra.mxu1 %v783_v29 }
  0x20   :  { %431 = vmatpush.bf16.msra.mxu2 %v791_v30 }
  0x21   :  { %460 = vmatpush.bf16.msra.mxu3 %v799_v31  ;;  %374 = vmatmul.bf16.vlgmr.msra.gmra.mxu0 %v570_v40 }
  0x22   :  { %403 = vmatmul.bf16.vlgmr.msra.gmra.mxu1 %v574_v41 }
  0x23   :  { %432 = vmatmul.bf16.vlgmr.msra.gmra.mxu2 %v578_v42 }
  0x24   :  { %461 = vmatmul.bf16.vlgmr.msra.gmra.mxu3 %v582_v43 }
  0x31   :  { %379 = vmatmul.bf16.gmra.mxu0 %v586_v52 }
  0x32   :  { %408 = vmatmul.bf16.gmra.mxu1 %v590_v53 }
  0x33   :  { %437 = vmatmul.bf16.gmra.mxu2 %v594_v54 }
  0x34   :  { %466 = vmatmul.bf16.gmra.mxu3 %v598_v55 }
  0x41   :  { %384 = vmatmul.bf16.gmra.mxu0 %v602_v0 }
  0x42   :  { %413 = vmatmul.bf16.gmra.mxu1 %v606_v1 }
  0x43   :  { %442 = vmatmul.bf16.gmra.mxu2 %v610_v2 }
  0x44   :  { %471 = vmatmul.bf16.gmra.mxu3 %v614_v3 }
  0x51   :  { %389 = vmatmul.bf16.gmra.mxu0 %v618_v12 }
  0x52   :  { %418 = vmatmul.bf16.gmra.mxu1 %v622_v13 }
  0x53   :  { %447 = vmatmul.bf16.gmra.mxu2 %v626_v14 }
  0x54   :  { %476 = vmatmul.bf16.gmra.mxu3 %v630_v15 }
  0x9e   :  { %v375_v16 = vpop.f32.mrf.mxu0 }
  0x9f   :  { %v404_v17 = vpop.f32.mrf.mxu1 }
  0xa0   :  { %v405_v18 = vadd.f32 %v404_v17, %v375_v16 }
  0xa6   :  { %v433_v19 = vpop.f32.mrf.mxu2  ;;  %v377_v22 = vpop.f32.mrf.mxu0 }
  0xa7   :  { %v462_v20 = vpop.f32.mrf.mxu3  ;;  %v434_v21 = vadd.f32 %v433_v19, %v405_v18  ;;  %v406_v23 = vpop.f32.mrf.mxu1 }
  0xa8   :  { %v407_v26 = vadd.f32 %v406_v23, %v377_v22 }
  0xa9   :  { %v463_v24 = vadd.f32 %v462_v20, %v434_v21 }
  0xab   :  { %498 = vadd.xlane.f32.xlu0 %v463_v24  ;;  %v523_v25 = vmul.f32 %v463_v24, %v463_v24 }
  0xad   :  { %531 = vadd.xlane.f32.xlu2 %v523_v25 }
  0xae   :  { %v435_v27 = vpop.f32.mrf.mxu2  ;;  %v380_v30 = vpop.f32.mrf.mxu0 }
  0xaf   :  { %v464_v28 = vpop.f32.mrf.mxu3  ;;  %v436_v29 = vadd.f32 %v435_v27, %v407_v26  ;;  %v409_v31 = vpop.f32.mrf.mxu1 }
  0xb0   :  { %v410_v34 = vadd.f32 %v409_v31, %v380_v30 }
  0xb1   :  { %v465_v32 = vadd.f32 %v464_v28, %v436_v29 }
  0xb3   :  { %v810_v33 = vpack.c.bf16 %v465_v32, %v463_v24  ;;  %500 = vadd.xlane.f32.xlu0 %v465_v32  ;;  %v524_v41 = vmul.f32 %v465_v32, %v465_v32 }
  0xb5   :  { %811 = vst [vmem:[%s1125_s2] sm:$0xff] %v810_v33  }
  0xb6   :  { %v438_v35 = vpop.f32.mrf.mxu2  ;;  %v382_v38 = vpop.f32.mrf.mxu0 }
  0xb7   :  { %v467_v36 = vpop.f32.mrf.mxu3  ;;  %v439_v37 = vadd.f32 %v438_v35, %v410_v34  ;;  %v411_v39 = vpop.f32.mrf.mxu1 }
  0xb8   :  { %v412_v42 = vadd.f32 %v411_v39, %v382_v38 }
  0xb9   :  { %v468_v40 = vadd.f32 %v467_v36, %v439_v37 }
  0xbb   :  { %502 = vadd.xlane.f32.xlu1 %v468_v40  ;;  %533 = vadd.xlane.f32.xlu0 %v524_v41  ;;  %v525_v49 = vmul.f32 %v468_v40, %v468_v40 }
  0xbe   :  { %v440_v43 = vpop.f32.mrf.mxu2  ;;  %v385_v46 = vpop.f32.mrf.mxu0 }
  0xbf   :  { %v469_v44 = vpop.f32.mrf.mxu3  ;;  %v441_v45 = vadd.f32 %v440_v43, %v412_v42  ;;  %v414_v47 = vpop.f32.mrf.mxu1 }
  0xc0   :  { %v415_v51 = vadd.f32 %v414_v47, %v385_v46 }
  0xc1   :  { %v470_v48 = vadd.f32 %v469_v44, %v441_v45 }
  0xc3   :  { %v815_v50 = vpack.c.bf16 %v470_v48, %v468_v40  ;;  %535 = vadd.xlane.f32.xlu1 %v525_v49  ;;  %v526_v52 = vmul.f32 %v470_v48, %v470_v48 }
  0xc5   :  { %827 = vst [vmem:[%s1125_s2 + $0x8] sm:$0xff] %v815_v50   ;;  %537 = vadd.xlane.f32.xlu2 %v526_v52 }
  0xc6   :  { %v443_v53 = vpop.f32.mrf.mxu2  ;;  %v387_v56 = vpop.f32.mrf.mxu0 }
  0xc7   :  { %v472_v54 = vpop.f32.mrf.mxu3  ;;  %v444_v55 = vadd.f32 %v443_v53, %v415_v51  ;;  %v416_v57 = vpop.f32.mrf.mxu1 }
  0xc8   :  { %v417_v60 = vadd.f32 %v416_v57, %v387_v56 }
  0xc9   :  { %v473_v58 = vadd.f32 %v472_v54, %v444_v55 }
  0xcb   :  { %504 = vadd.xlane.f32.xlu1 %v470_v48  ;;  %v527_v59 = vmul.f32 %v473_v58, %v473_v58 }
  0xcd   :  { %539 = vadd.xlane.f32.xlu0 %v527_v59  ;;  %506 = vadd.xlane.f32.xlu2 %v473_v58 }
  0xce   :  { %v445_v61 = vpop.f32.mrf.mxu2  ;;  %v390_v0 = vpop.f32.mrf.mxu0 }
  0xcf   :  { %v474_v62 = vpop.f32.mrf.mxu3  ;;  %v446_v63 = vadd.f32 %v445_v61, %v417_v60  ;;  %v419_v1 = vpop.f32.mrf.mxu1 }
  0xd0   :  { %v420_v4 = vadd.f32 %v419_v1, %v390_v0 }
  0xd1   :  { %v475_v2 = vadd.f32 %v474_v62, %v446_v63 }
  0xd3   :  { %v820_v3 = vpack.c.bf16 %v475_v2, %v473_v58  ;;  %v528_v19 = vmul.f32 %v475_v2, %v475_v2 }
  0xd5   :  { %828 = vst [vmem:[%s1125_s2 + $0x10] sm:$0xff] %v820_v3   ;;  %508 = vadd.xlane.f32.xlu2 %v475_v2 }
  0xd6   :  { %v448_v5 = vpop.f32.mrf.mxu2  ;;  %v392_v9 = vpop.f32.mrf.mxu0 }
  0xd7   :  { %v477_v6 = vpop.f32.mrf.mxu3  ;;  %v449_v7 = vadd.f32 %v448_v5, %v420_v4  ;;  %v421_v10 = vpop.f32.mrf.mxu1 }
  0xd8   :  { %v422_v12 = vadd.f32 %v421_v10, %v392_v9 }
  0xd9   :  { %v478_v8 = vadd.f32 %v477_v6, %v449_v7 }
  0xdb   :  { %510 = vadd.xlane.f32.xlu0 %v478_v8  ;;  %v529_v11 = vmul.f32 %v478_v8, %v478_v8 }
  0xdd   :  { %543 = vadd.xlane.f32.xlu2 %v529_v11 }
  0xde   :  { %v450_v13 = vpop.f32.mrf.mxu2 }
  0xdf   :  { %v451_v14 = vadd.f32 %v450_v13, %v422_v12  ;;  %v479_v15 = vpop.f32.mrf.mxu3 }
  0xe1   :  { %v480_v16 = vadd.f32 %v479_v15, %v451_v14 }
  0xe3   :  { %v825_v17 = vpack.c.bf16 %v480_v16, %v478_v8  ;;  %512 = vadd.xlane.f32.xlu1 %v480_v16  ;;  %v530_v18 = vmul.f32 %v480_v16, %v480_v16 }
  0xe5   :  { %829 = vst [vmem:[%s1125_s2 + $0x18] sm:$0xff] %v825_v17   ;;  %545 = vadd.xlane.f32.xlu0 %v530_v18 }
  0xeb   :  { %541 = vadd.xlane.f32.xlu1 %v528_v19 }
 0x11e   :  { %v499_v20 = vpop.xlane.xlu0 %498 }
 0x11f   :  { %515 = vst.msk [vmem:[%s1126_s3] sm:$0xff] %vm514_vm0, %v499_v20 }
 0x120   :  { %v532_v21 = vpop.xlane.xlu2 %531 }
 0x121   :  { %547 = vst.msk [vmem:[%s1127_s4] sm:$0xff] %vm514_vm0, %v532_v21 }
 0x126   :  { %v501_v22 = vpop.xlane.xlu0 %500 }
 0x127   :  { %516 = vst.msk [vmem:[%s1126_s3 + $0x8] sm:$0xff] %vm514_vm0, %v501_v22 }
 0x12e   :  { %v503_v23 = vpop.xlane.xlu1 %502  ;;  %v534_v24 = vpop.xlane.xlu0 %533 }
 0x12f   :  { %517 = vst.msk [vmem:[%s1126_s3 + $0x10] sm:$0xff] %vm514_vm0, %v503_v23 }
 0x130   :  { %548 = vst.msk [vmem:[%s1127_s4 + $0x8] sm:$0xff] %vm514_vm0, %v534_v24 }
 0x136   :  { %v536_v25 = vpop.xlane.xlu1 %535 }
 0x137   :  { %549 = vst.msk [vmem:[%s1127_s4 + $0x10] sm:$0xff] %vm514_vm0, %v536_v25 }
 0x138   :  { %v538_v26 = vpop.xlane.xlu2 %537 }
 0x139   :  { %550 = vst.msk [vmem:[%s1127_s4 + $0x18] sm:$0xff] %vm514_vm0, %v538_v26 }
 0x13e   :  { %v505_v27 = vpop.xlane.xlu1 %504 }
 0x13f   :  { %518 = vst.msk [vmem:[%s1126_s3 + $0x18] sm:$0xff] %vm514_vm0, %v505_v27 }
 0x140   :  { %v540_v28 = vpop.xlane.xlu0 %539  ;;  %v507_v29 = vpop.xlane.xlu2 %506 }
 0x141   :  { %551 = vst.msk [vmem:[%s1127_s4 + $0x20] sm:$0xff] %vm514_vm0, %v540_v28 }
 0x142   :  { %519 = vst.msk [vmem:[%s1126_s3 + $0x20] sm:$0xff] %vm514_vm0, %v507_v29 }
 0x148   :  { %v509_v30 = vpop.xlane.xlu2 %508 }
 0x149   :  { %520 = vst.msk [vmem:[%s1126_s3 + $0x28] sm:$0xff] %vm514_vm0, %v509_v30 }
 0x14e   :  { %v511_v31 = vpop.xlane.xlu0 %510 }
 0x14f   :  { %521 = vst.msk [vmem:[%s1126_s3 + $0x30] sm:$0xff] %vm514_vm0, %v511_v31 }
 0x150   :  { %v544_v32 = vpop.xlane.xlu2 %543 }
 0x151   :  { %553 = vst.msk [vmem:[%s1127_s4 + $0x30] sm:$0xff] %vm514_vm0, %v544_v32 }
 0x156   :  { %v513_v33 = vpop.xlane.xlu1 %512 }
 0x157   :  { %522 = vst.msk [vmem:[%s1126_s3 + $0x38] sm:$0xff] %vm514_vm0, %v513_v33 }
 0x158   :  { %v546_v34 = vpop.xlane.xlu0 %545 }
 0x159   :  { %554 = vst.msk [vmem:[%s1127_s4 + $0x38] sm:$0xff] %vm514_vm0, %v546_v34 }
 0x15e   :  { %v542_v35 = vpop.xlane.xlu1 %541 }
 0x15f   :  { %552 = vst.msk [vmem:[%s1127_s4 + $0x28] sm:$0xff] %vm514_vm0, %v542_v35 }

</bundles_post_ra>
